<compile_context>
chip_gen: v6e
topology: v6e:2x2x1
jax: 0.10.0
libtpu: 0.0.40
codegen_flags: <defaults>
</compile_context>

<pallas_src>
import functools
import math

import jax
import jax.numpy as jnp
from jax import lax
from jax.experimental import pallas as pl
from jax.experimental.pallas import tpu as pltpu


def _round_up(x, m):
    return ((x + m - 1) // m) * m


def _vmem_tile_bytes(shape, itemsize=4):
    """VMEM footprint of an f32 array after (8,128) tile padding."""
    if len(shape) == 0:
        return itemsize
    if len(shape) == 1:
        rows, cols = 1, shape[0]
    else:
        rows, cols = int(math.prod(shape[:-1])), shape[-1]
    return _round_up(rows, 8) * _round_up(max(cols, 1), 128) * itemsize


# ----------------------------------------------------------------------------
# Fused forward kernel: encoder + 3 EquiAttentionBlocks + readout
# grid = (num_layers, num_query_tiles)
# ----------------------------------------------------------------------------
def fused_forward_kernel(
    # inputs
    cw_ref,                       # SMEM [5*L, H]  coord-path weights per layer:
                                  #   (we1_x, we1_y, be1, We2@Wco, [bcf,0..])
    x_ref,                        # [Npad, Din]    [pos | attr | gattr[batch]]
    wenc_ref, benc_ref,           # [Din, H], [1, H]
    pos0_ref,                     # [Npad, 2]
    wqkv_ref, bqkv_ref,           # blocked per layer: [1, H, 3H], [1, 1, 3H]
    pool_ref,                     # [G, Npad]  mean-pool matrix
    w1_ref, b1_ref, w2_ref, b2_ref,
    # output
    out_ref,                      # [G, O]
    # scratch
    h_state, pos_old, pos_new, posT, q_all, k_all, v_all, maskb,
    *, n_valid, npad, hidden, tq,
):
    l = pl.program_id(0)
    t = pl.program_id(1)
    num_l = pl.num_programs(0)
    num_t = pl.num_programs(1)

    # ---- one-time additive padding-mask bias (only when padding exists) -----
    if npad != n_valid:
        @pl.when((l == 0) & (t == 0))
        def _():
            lane = lax.broadcasted_iota(jnp.int32, (1, npad), 1)
            maskb[...] = jnp.where(lane < n_valid, 0.0, -1e30)

    # ---------------- per-layer setup (first query tile of each layer) -------
    @pl.when(t == 0)
    def _():
        @pl.when(l == 0)
        def _():
            # fused encoder: h = [pos|attr|gattr] @ [Wc;Wa;Wg] + (bc+ba+bg)
            h_state[...] = (
                jnp.dot(x_ref[...], wenc_ref[...],
                        preferred_element_type=jnp.float32) + benc_ref[...])
            pos_old[...] = pos0_ref[...]

        @pl.when(l > 0)
        def _():
            pos_old[...] = pos_new[...]

        # fused q|k|v projection: one [Npad,H]@[H,3H] MXU matmul per layer.
        # The 1/sqrt(H) attention scale is already folded into the q slice.
        qkv = (jnp.dot(h_state[...], wqkv_ref[0],
                       preferred_element_type=jnp.float32) + bqkv_ref[0])
        q_all[...] = qkv[:, :hidden]
        k_all[...] = qkv[:, hidden:2 * hidden]
        v_all[...] = qkv[:, 2 * hidden:]

        # lane-major x / y coordinate rows of all nodes: posT = eye(2) @ pos_old^T
        eye2 = (lax.broadcasted_iota(jnp.int32, (2, 2), 0)
                == lax.broadcasted_iota(jnp.int32, (2, 2), 1)).astype(jnp.float32)
        posT[...] = lax.dot_general(eye2, pos_old[...],
                                    (((1,), (1,)), ((), ())),
                                    preferred_element_type=jnp.float32)

    # ---------------- per query-tile attention + coordinate update -----------
    row0 = pl.multiple_of(t * tq, tq)
    q_t = q_all[pl.ds(row0, tq), :]                 # [TQ, H]   (already scaled)
    h_t = h_state[pl.ds(row0, tq), :]               # [TQ, H]
    pos_t = pos_old[pl.ds(row0, tq), :]             # [TQ, 2]
    k = k_all[...]                                  # [Npad, H]
    v = v_all[...]                                  # [Npad, H]
    pos_all = pos_old[...]                          # [Npad, 2]

    # attention logits on the MXU:  q_t · k^T
    logits = lax.dot_general(q_t, k, (((1,), (1,)), ((), ())),
                             preferred_element_type=jnp.float32)            # [TQ, Npad]
    if npad != n_valid:
        logits = logits + maskb[...]                # precomputed additive bias

    m = jnp.max(logits, axis=-1, keepdims=True)
    p = jnp.exp(logits - m)
    denom = jnp.sum(p, axis=-1, keepdims=True)
    attn = p * pl.reciprocal(denom, approx=True)    # EUP reciprocal, not a VALU divide

    agg = jnp.dot(attn, v, preferred_element_type=jnp.float32)               # [TQ, H]
    h_new = h_t + agg

    # coord[i,j] = relu(rel_ij . We1 + be1) . (We2 @ Wco) + bcf
    qx = pos_t[:, 0:1]
    qy = pos_t[:, 1:2]
    kx = posT[0:1, :]
    ky = posT[1:2, :]
    dx = qx - kx                                                             # [TQ, Npad]
    dy = qy - ky
    base = 5 * l
    bcf = cw_ref[base + 4, 0]
    coord = jnp.zeros((tq, npad), jnp.float32) + bcf
    # Fully unrolled over H (VALU hotspot): straight-line code lets the 4 VALU slots,
    # the scalar unit (SMEM weight loads) and the MXU logits/agg overlap.
    # TODO(synk): at large N switch to key tiles + two MXU matmuls per (TQ,TK) tile.
    for hh in range(hidden):
        a = cw_ref[base + 0, hh]
        b = cw_ref[base + 1, hh]
        c = cw_ref[base + 2, hh]
        wf = cw_ref[base + 3, hh]
        e = jnp.maximum(dx * a + dy * b + c, 0.0)
        coord = coord + e * wf

    # delta_i = sum_j attn*coord * (pos_i - pos_j)
    wmat = attn * coord                                                      # [TQ, Npad]
    wsum = jnp.sum(wmat, axis=-1, keepdims=True)                             # [TQ, 1]
    wpos = jnp.dot(wmat, pos_all, preferred_element_type=jnp.float32)        # [TQ, 2]
    pos_new_t = pos_t + (pos_t * wsum - wpos)

    h_state[pl.ds(row0, tq), :] = h_new
    pos_new[pl.ds(row0, tq), :] = pos_new_t

    # ---------------- readout at the very last grid step ---------------------
    @pl.when((l == num_l - 1) & (t == num_t - 1))
    def _():
        gh = jnp.dot(pool_ref[...], h_state[...],
                     preferred_element_type=jnp.float32)                     # [G, H]
        hid = jnp.maximum(
            jnp.dot(gh, w1_ref[...], preferred_element_type=jnp.float32) + b1_ref[...], 0.0)
        out_ref[...] = (jnp.dot(hid, w2_ref[...], preferred_element_type=jnp.float32)
                        + b2_ref[...])


# ----------------------------------------------------------------------------
# pallas_call wrapper
# ----------------------------------------------------------------------------
def _const_spec(shape):
    nd = len(shape)
    return pl.BlockSpec(shape, lambda l, t, nd=nd: (0,) * nd)


def _layer_spec(shape):
    block = (1,) + tuple(shape[1:])
    nd = len(shape)
    return pl.BlockSpec(block, lambda l, t, nd=nd: (l,) + (0,) * (nd - 1))


@functools.partial(jax.jit, static_argnames=("num_graphs",))
def equi_structure_regressor(params, attr, pos, batch, graph_attr, num_graphs):
    N = pos.shape[0]
    enc = params["enc"]
    H = enc["wc"].shape[1]
    blocks = params["blocks"]
    L = len(blocks)
    ro = params["ro"]
    O = ro["w2"].shape[1]
    scale = 1.0 / math.sqrt(H)

    # query-tile size / padding (TQ multiple of 8 sublanes; 128 for large N)
    TQ = 128 if N >= 128 else _round_up(N, 8)
    Npad = _round_up(N, TQ)
    T = Npad // TQ

    # --- glue (pure index bookkeeping / weight repacking) ---
    gg = graph_attr[batch]                                                  # [N, Gd]
    x_cat = jnp.concatenate([pos, attr, gg], axis=1).astype(jnp.float32)    # [N, Din]
    pos_p = pos.astype(jnp.float32)
    if Npad != N:
        x_cat = jnp.pad(x_cat, ((0, Npad - N), (0, 0)))
        pos_p = jnp.pad(pos_p, ((0, Npad - N), (0, 0)))
    w_enc = jnp.concatenate([enc["wc"], enc["wa"], enc["wg"]], axis=0)      # [Din, H]
    b_enc = enc["bc"] + enc["ba"] + enc["bg"]                               # [1, H]
    Din = w_enc.shape[0]

    # fused q|k|v weights per layer; 1/sqrt(H) folded into the q slice
    wqkv = jnp.stack([jnp.concatenate([b["wq"] * scale, b["wk"], b["wv"]], axis=1)
                      for b in blocks])                                     # [L, H, 3H]
    bqkv = jnp.stack([jnp.concatenate([b["bq"] * scale, b["bk"], b["bv"]], axis=1)
                      for b in blocks])                                     # [L, 1, 3H]

    # coord path: fold edge-MLP layer 2 into the coord head (exact algebra)
    cw_rows = []
    for b in blocks:
        wcf = b["we2"] @ b["wco"]                        # [H, 1]
        bcf = (b["be2"] @ b["wco"] + b["bco"])[0, 0]     # scalar
        last = jnp.zeros((H,), jnp.float32).at[0].set(bcf)
        cw_rows.append(jnp.stack([b["we1"][0], b["we1"][1], b["be1"][0],
                                  wcf[:, 0], last]))
    cw = jnp.concatenate(cw_rows, axis=0)                # [5L, H]  (lives in SMEM)

    # mean-pool matrix (scatter_mean == pool @ h)
    onehot = (batch[None, :] == jnp.arange(num_graphs)[:, None]).astype(jnp.float32)
    counts = jnp.maximum(jnp.sum(onehot, axis=1, keepdims=True), 1.0)
    pool = onehot / counts                               # [G, N]
    if Npad != N:
        pool = jnp.pad(pool, ((0, 0), (0, Npad - N)))

    kernel = functools.partial(fused_forward_kernel, n_valid=N, npad=Npad,
                               hidden=H, tq=TQ)

    # --- explicit VMEM budget: scratch + double-buffered resident inputs + live tiles ---
    scratch_list = [(Npad, H), (Npad, 2), (Npad, 2), (2, Npad),
                    (Npad, H), (Npad, H), (Npad, H), (1, Npad)]
    input_list = [(Npad, Din), (Din, H), (1, H), (Npad, 2), (H, 3 * H), (1, 3 * H),
                  (num_graphs, Npad), (H, H), (1, H), (H, O), (1, O), (num_graphs, O)]
    vmem_need = (sum(_vmem_tile_bytes(s) for s in scratch_list)
                 + 2 * sum(_vmem_tile_bytes(s) for s in input_list)
                 + 8 * _vmem_tile_bytes((TQ, Npad)))
    vmem_limit = min(128 * 1024 * 1024,
                     max(32 * 1024 * 1024, int(1.5 * vmem_need)))

    flops = int(2 * Npad * Din * H
                + L * (6 * Npad * H * H + 11 * Npad * Npad * H + 6 * Npad * Npad)
                + 2 * num_graphs * (Npad * H + H * H + H * O))
    bytes_accessed = int(4 * (x_cat.size + pos_p.size + w_enc.size + b_enc.size
                              + wqkv.size + bqkv.size + cw.size + pool.size
                              + ro["w1"].size + ro["b1"].size
                              + ro["w2"].size + ro["b2"].size + num_graphs * O))

    return pl.pallas_call(
        kernel,
        out_shape=jax.ShapeDtypeStruct((num_graphs, O), jnp.float32),
        grid=(L, T),
        in_specs=[
            pl.BlockSpec(memory_space=pltpu.MemorySpace.SMEM),   # cw (scalar table)
            _const_spec((Npad, Din)),                            # x_cat
            _const_spec((Din, H)),                               # w_enc
            _const_spec((1, H)),                                 # b_enc
            _const_spec((Npad, 2)),                              # pos0
            _layer_spec((L, H, 3 * H)),                          # wqkv (per layer)
            _layer_spec((L, 1, 3 * H)),                          # bqkv (per layer)
            _const_spec((num_graphs, Npad)),                     # pool
            _const_spec((H, H)),                                 # w1
            _const_spec((1, H)),                                 # b1
            _const_spec((H, O)),                                 # w2
            _const_spec((1, O)),                                 # b2
        ],
        out_specs=pl.BlockSpec((num_graphs, O), lambda l, t: (0, 0)),
        scratch_shapes=[
            pltpu.VMEM((Npad, H), jnp.float32),   # h_state
            pltpu.VMEM((Npad, 2), jnp.float32),   # pos_old
            pltpu.VMEM((Npad, 2), jnp.float32),   # pos_new
            pltpu.VMEM((2, Npad), jnp.float32),   # posT  (lane-major coords)
            pltpu.VMEM((Npad, H), jnp.float32),   # q_all
            pltpu.VMEM((Npad, H), jnp.float32),   # k_all
            pltpu.VMEM((Npad, H), jnp.float32),   # v_all
            pltpu.VMEM((1, Npad), jnp.float32),   # padding-mask additive bias
        ],
        compiler_params=pltpu.CompilerParams(
            dimension_semantics=("arbitrary", "arbitrary"),
            vmem_limit_bytes=vmem_limit),
        cost_estimate=pl.CostEstimate(flops=flops,
                                      transcendentals=int(L * Npad * Npad),
                                      bytes_accessed=bytes_accessed),
    )(cw, x_cat, w_enc, b_enc, pos_p, wqkv, bqkv,
      pool, ro["w1"], ro["b1"], ro["w2"], ro["b2"])


# ----------------------------------------------------------------------------
# Pure-JAX reference (mirrors the torch forward exactly)
# ----------------------------------------------------------------------------
def reference_forward(params, attr, pos, batch, graph_attr, num_graphs):
    enc = params["enc"]
    h = (pos @ enc["wc"] + enc["bc"]
         + attr @ enc["wa"] + enc["ba"]
         + graph_attr[batch] @ enc["wg"] + enc["bg"])
    for bp in params["blocks"]:
        rel = pos[:, None, :] - pos[None, :, :]                       # [N, N, 2]
        e1 = jax.nn.relu(rel @ bp["we1"] + bp["be1"])
        edge = e1 @ bp["we2"] + bp["be2"]
        coord = edge @ bp["wco"] + bp["bco"]                          # [N, N, 1]
        q = h @ bp["wq"] + bp["bq"]
        k = h @ bp["wk"] + bp["bk"]
        v = h @ bp["wv"] + bp["bv"]
        logits = (q[:, None, :] * k[None, :, :]).sum(-1) / (h.shape[-1] ** 0.5)
        attn = jax.nn.softmax(logits, axis=-1)
        agg = attn @ v
        delta = (attn[:, :, None] * (coord * rel)).sum(axis=1)
        h = h + agg
        pos = pos + delta
    counts = jnp.zeros((num_graphs,), jnp.float32).at[batch].add(1.0)
    sums = jnp.zeros((num_graphs, h.shape[-1]), jnp.float32).at[batch].add(h)
    gh = sums / jnp.maximum(counts, 1.0)[:, None]
    ro = params["ro"]
    hid = jax.nn.relu(gh @ ro["w1"] + ro["b1"])
    return hid @ ro["w2"] + ro["b2"]


# ----------------------------------------------------------------------------
# Deterministic parameter init
# ----------------------------------------------------------------------------
def init_linear(key, din, dout, w_scale=0.2):
    kw, kb = jax.random.split(key)
    w = jax.random.normal(kw, (din, dout), jnp.float32) * w_scale
    b = jax.random.normal(kb, (1, dout), jnp.float32) * 0.05
    return w, b


def init_params(key, node_attr_dim, global_attr_dim, output_dim, hidden_dim):
    keys = jax.random.split(key, 32)
    ki = iter(keys)
    wc, bc = init_linear(next(ki), 2, hidden_dim)
    wa, ba = init_linear(next(ki), node_attr_dim, hidden_dim)
    wg, bg = init_linear(next(ki), global_attr_dim, hidden_dim)
    params = {"enc": {"wc": wc, "bc": bc, "wa": wa, "ba": ba, "wg": wg, "bg": bg},
              "blocks": [], "ro": {}}
    for _ in range(3):
        wq, bq = init_linear(next(ki), hidden_dim, hidden_dim)
        wk, bk = init_linear(next(ki), hidden_dim, hidden_dim)
        wv, bv = init_linear(next(ki), hidden_dim, hidden_dim)
        we1, be1 = init_linear(next(ki), 2, hidden_dim)
        we2, be2 = init_linear(next(ki), hidden_dim, hidden_dim)
        wco, bco = init_linear(next(ki), hidden_dim, 1)
        params["blocks"].append({"wq": wq, "bq": bq, "wk": wk, "bk": bk,
                                 "wv": wv, "bv": bv, "we1": we1, "be1": be1,
                                 "we2": we2, "be2": be2, "wco": wco, "bco": bco})
    w1, b1 = init_linear(next(ki), hidden_dim, hidden_dim)
    w2, b2 = init_linear(next(ki), hidden_dim, output_dim)
    params["ro"] = {"w1": w1, "b1": b1, "w2": w2, "b2": b2}
    return params


# ----------------------------------------------------------------------------
# Main
# ----------------------------------------------------------------------------
if __name__ == "__main__":
    NODE_ATTR_DIM = 4
    GLOBAL_ATTR_DIM = 4
    OUTPUT_DIM = 3
    HIDDEN_DIM = 32
    N_NODES = 8
    N_GRAPHS = 2

    key = jax.random.PRNGKey(0)
    kp, k1, k2, k3 = jax.random.split(key, 4)

    params = init_params(kp, NODE_ATTR_DIM, GLOBAL_ATTR_DIM, OUTPUT_DIM, HIDDEN_DIM)

    hole_attr = jax.random.normal(k1, (N_NODES, NODE_ATTR_DIM), jnp.float32)
    hole_pos = jax.random.normal(k2, (N_NODES, 2), jnp.float32)
    global_attr = jax.random.normal(k3, (N_GRAPHS, GLOBAL_ATTR_DIM), jnp.float32)
    batch = jnp.array([0, 0, 0, 0, 1, 1, 1, 1], jnp.int32)

    out = equi_structure_regressor(params, hole_attr, hole_pos, batch,
                                   global_attr, num_graphs=N_GRAPHS)
    out = jax.block_until_ready(out)

    ref = reference_forward(params, hole_attr, hole_pos, batch,
                            global_attr, N_GRAPHS)
    assert out.shape == (N_GRAPHS, OUTPUT_DIM)
    assert jnp.allclose(out, ref, rtol=1e-3, atol=1e-3), (out, ref)

    print("KERNEL_OK")
</pallas_src>

<mosaic_0001>
module attributes {stable_mosaic.version = 11 : i64} {
  func.func @fused_forward_kernel(%arg0: i32, %arg1: i32, %arg2: memref<15x32xf32, #tpu.memory_space<smem>>, %arg3: memref<8x10xf32, #tpu.memory_space<vmem>>, %arg4: memref<10x32xf32, #tpu.memory_space<vmem>>, %arg5: memref<1x32xf32, #tpu.memory_space<vmem>>, %arg6: memref<8x2xf32, #tpu.memory_space<vmem>>, %arg7: memref<1x32x96xf32, #tpu.memory_space<vmem>>, %arg8: memref<1x1x96xf32, #tpu.memory_space<vmem>>, %arg9: memref<2x8xf32, #tpu.memory_space<vmem>>, %arg10: memref<32x32xf32, #tpu.memory_space<vmem>>, %arg11: memref<1x32xf32, #tpu.memory_space<vmem>>, %arg12: memref<32x3xf32, #tpu.memory_space<vmem>>, %arg13: memref<1x3xf32, #tpu.memory_space<vmem>>, %arg14: memref<2x3xf32, #tpu.memory_space<vmem>>, %arg15: memref<8x32xf32, #tpu.memory_space<vmem>>, %arg16: memref<8x2xf32, #tpu.memory_space<vmem>>, %arg17: memref<8x2xf32, #tpu.memory_space<vmem>>, %arg18: memref<2x8xf32, #tpu.memory_space<vmem>>, %arg19: memref<8x32xf32, #tpu.memory_space<vmem>>, %arg20: memref<8x32xf32, #tpu.memory_space<vmem>>, %arg21: memref<8x32xf32, #tpu.memory_space<vmem>>, %arg22: memref<1x8xf32, #tpu.memory_space<vmem>>) attributes {dimension_semantics = [#tpu.dimension_semantics<arbitrary>, #tpu.dimension_semantics<arbitrary>], iteration_bounds = array<i64: 3, 1>, scalar_prefetch = 0 : i64, scratch_operands = 8 : i64, tpu.core_type = #tpu.core_type<tc>, window_params = [{transform_indices = @transform_0, window_bounds = array<i64: 15, 32>}, {pipeline_mode = #tpu.pipeline_mode<synchronous>, transform_indices = @transform_1, window_bounds = array<i64: 8, 10>}, {pipeline_mode = #tpu.pipeline_mode<synchronous>, transform_indices = @transform_2, window_bounds = array<i64: 10, 32>}, {pipeline_mode = #tpu.pipeline_mode<synchronous>, transform_indices = @transform_3, window_bounds = array<i64: 1, 32>}, {pipeline_mode = #tpu.pipeline_mode<synchronous>, transform_indices = @transform_4, window_bounds = array<i64: 8, 2>}, {transform_indices = @transform_5, window_bounds = array<i64: 1, 32, 96>}, {transform_indices = @transform_6, window_bounds = array<i64: 1, 1, 96>}, {pipeline_mode = #tpu.pipeline_mode<synchronous>, transform_indices = @transform_7, window_bounds = array<i64: 2, 8>}, {pipeline_mode = #tpu.pipeline_mode<synchronous>, transform_indices = @transform_8, window_bounds = array<i64: 32, 32>}, {pipeline_mode = #tpu.pipeline_mode<synchronous>, transform_indices = @transform_9, window_bounds = array<i64: 1, 32>}, {pipeline_mode = #tpu.pipeline_mode<synchronous>, transform_indices = @transform_10, window_bounds = array<i64: 32, 3>}, {pipeline_mode = #tpu.pipeline_mode<synchronous>, transform_indices = @transform_11, window_bounds = array<i64: 1, 3>}, {pipeline_mode = #tpu.pipeline_mode<synchronous>, transform_indices = @transform_12, window_bounds = array<i64: 2, 3>}]} {
    %c0_i32 = arith.constant 0 : i32
    %0 = arith.cmpi eq, %arg1, %c0_i32 : i32
    %1 = arith.extui %0 : i1 to i32
    %c0_i32_0 = arith.constant 0 : i32
    %2 = arith.cmpi ne, %1, %c0_i32_0 : i32
    scf.if %2 {
      %c0_i32_279 = arith.constant 0 : i32
      %829 = arith.cmpi eq, %arg0, %c0_i32_279 : i32
      %830 = arith.extui %829 : i1 to i32
      %c0_i32_280 = arith.constant 0 : i32
      %831 = arith.cmpi ne, %830, %c0_i32_280 : i32
      scf.if %831 {
        %c0_303 = arith.constant 0 : index
        %c0_304 = arith.constant 0 : index
        %857 = vector.load %arg3[%c0_303, %c0_304] : memref<8x10xf32, #tpu.memory_space<vmem>>, vector<8x10xf32>
        %c0_305 = arith.constant 0 : index
        %c0_306 = arith.constant 0 : index
        %858 = vector.load %arg4[%c0_305, %c0_306] : memref<10x32xf32, #tpu.memory_space<vmem>>, vector<10x32xf32>
        %cst_307 = arith.constant dense<0.000000e+00> : vector<8x32xf32>
        %859 = tpu.matmul %857, %858, %cst_307 {dimension_numbers = #tpu.dot_dimension_numbers<[1], [0], [0], [1], [0, 0, 1, 1], [], []>} : vector<8x10xf32>, vector<10x32xf32>, vector<8x32xf32> -> vector<8x32xf32>
        %c0_308 = arith.constant 0 : index
        %c0_309 = arith.constant 0 : index
        %860 = vector.load %arg5[%c0_308, %c0_309] : memref<1x32xf32, #tpu.memory_space<vmem>>, vector<1x32xf32>
        %861 = vector.broadcast %860 : vector<1x32xf32> to vector<8x32xf32>
        %862 = arith.addf %859, %861 : vector<8x32xf32>
        %c0_310 = arith.constant 0 : index
        %c0_311 = arith.constant 0 : index
        %863 = vector.load %arg15[%c0_310, %c0_311] : memref<8x32xf32, #tpu.memory_space<vmem>>, vector<8x32xf32>
        tpu.vector_store %arg15[%c0_310, %c0_311], %862 {strides = array<i32>} : memref<8x32xf32, #tpu.memory_space<vmem>>, vector<8x32xf32>,
        %c0_312 = arith.constant 0 : index
        %c0_313 = arith.constant 0 : index
        %864 = vector.load %arg6[%c0_312, %c0_313] : memref<8x2xf32, #tpu.memory_space<vmem>>, vector<8x2xf32>
        %c0_314 = arith.constant 0 : index
        %c0_315 = arith.constant 0 : index
        %865 = vector.load %arg16[%c0_314, %c0_315] : memref<8x2xf32, #tpu.memory_space<vmem>>, vector<8x2xf32>
        tpu.vector_store %arg16[%c0_314, %c0_315], %864 {strides = array<i32>} : memref<8x2xf32, #tpu.memory_space<vmem>>, vector<8x2xf32>,
      } else {
      }
      %c0_i32_281 = arith.constant 0 : i32
      %832 = arith.cmpi sgt, %arg0, %c0_i32_281 : i32
      %833 = arith.extui %832 : i1 to i32
      %c0_i32_282 = arith.constant 0 : i32
      %834 = arith.cmpi ne, %833, %c0_i32_282 : i32
      scf.if %834 {
        %c0_303 = arith.constant 0 : index
        %c0_304 = arith.constant 0 : index
        %857 = vector.load %arg17[%c0_303, %c0_304] : memref<8x2xf32, #tpu.memory_space<vmem>>, vector<8x2xf32>
        %c0_305 = arith.constant 0 : index
        %c0_306 = arith.constant 0 : index
        %858 = vector.load %arg16[%c0_305, %c0_306] : memref<8x2xf32, #tpu.memory_space<vmem>>, vector<8x2xf32>
        tpu.vector_store %arg16[%c0_305, %c0_306], %857 {strides = array<i32>} : memref<8x2xf32, #tpu.memory_space<vmem>>, vector<8x2xf32>,
      } else {
      }
      %c0_283 = arith.constant 0 : index
      %c0_284 = arith.constant 0 : index
      %835 = vector.load %arg15[%c0_283, %c0_284] : memref<8x32xf32, #tpu.memory_space<vmem>>, vector<8x32xf32>
      %c0_285 = arith.constant 0 : index
      %c0_286 = arith.constant 0 : index
      %c0_287 = arith.constant 0 : index
      %836 = vector.load %arg7[%c0_285, %c0_286, %c0_287] : memref<1x32x96xf32, #tpu.memory_space<vmem>>, vector<1x32x96xf32>
      %837 = vector.shape_cast %836 : vector<1x32x96xf32> to vector<32x96xf32>
      %cst_288 = arith.constant dense<0.000000e+00> : vector<8x96xf32>
      %838 = tpu.matmul %835, %837, %cst_288 {dimension_numbers = #tpu.dot_dimension_numbers<[1], [0], [0], [1], [0, 0, 1, 1], [], []>} : vector<8x32xf32>, vector<32x96xf32>, vector<8x96xf32> -> vector<8x96xf32>
      %c0_289 = arith.constant 0 : index
      %c0_290 = arith.constant 0 : index
      %c0_291 = arith.constant 0 : index
      %839 = vector.load %arg8[%c0_289, %c0_290, %c0_291] : memref<1x1x96xf32, #tpu.memory_space<vmem>>, vector<1x1x96xf32>
      %840 = vector.shape_cast %839 : vector<1x1x96xf32> to vector<1x96xf32>
      %841 = vector.broadcast %840 : vector<1x96xf32> to vector<8x96xf32>
      %842 = arith.addf %838, %841 : vector<8x96xf32>
      %843 = vector.extract_strided_slice %842 {offsets = [0, 0], sizes = [8, 32], strides = [1, 1]} : vector<8x96xf32> to vector<8x32xf32>
      %c0_292 = arith.constant 0 : index
      %c0_293 = arith.constant 0 : index
      %844 = vector.load %arg19[%c0_292, %c0_293] : memref<8x32xf32, #tpu.memory_space<vmem>>, vector<8x32xf32>
      tpu.vector_store %arg19[%c0_292, %c0_293], %843 {strides = array<i32>} : memref<8x32xf32, #tpu.memory_space<vmem>>, vector<8x32xf32>,
      %845 = vector.extract_strided_slice %842 {offsets = [0, 32], sizes = [8, 32], strides = [1, 1]} : vector<8x96xf32> to vector<8x32xf32>
      %c0_294 = arith.constant 0 : index
      %c0_295 = arith.constant 0 : index
      %846 = vector.load %arg20[%c0_294, %c0_295] : memref<8x32xf32, #tpu.memory_space<vmem>>, vector<8x32xf32>
      tpu.vector_store %arg20[%c0_294, %c0_295], %845 {strides = array<i32>} : memref<8x32xf32, #tpu.memory_space<vmem>>, vector<8x32xf32>,
      %847 = vector.extract_strided_slice %842 {offsets = [0, 64], sizes = [8, 32], strides = [1, 1]} : vector<8x96xf32> to vector<8x32xf32>
      %c0_296 = arith.constant 0 : index
      %c0_297 = arith.constant 0 : index
      %848 = vector.load %arg21[%c0_296, %c0_297] : memref<8x32xf32, #tpu.memory_space<vmem>>, vector<8x32xf32>
      tpu.vector_store %arg21[%c0_296, %c0_297], %847 {strides = array<i32>} : memref<8x32xf32, #tpu.memory_space<vmem>>, vector<8x32xf32>,
      %849 = tpu.iota {dimensions = array<i32: 0>} : vector<2x2xi32>
      %850 = tpu.iota {dimensions = array<i32: 1>} : vector<2x2xi32>
      %851 = arith.cmpi eq, %849, %850 : vector<2x2xi32>
      %852 = arith.extui %851 : vector<2x2xi1> to vector<2x2xi32>
      %853 = arith.sitofp %852 : vector<2x2xi32> to vector<2x2xf32>
      %c0_298 = arith.constant 0 : index
      %c0_299 = arith.constant 0 : index
      %854 = vector.load %arg16[%c0_298, %c0_299] : memref<8x2xf32, #tpu.memory_space<vmem>>, vector<8x2xf32>
      %cst_300 = arith.constant dense<0.000000e+00> : vector<2x8xf32>
      %855 = tpu.matmul %853, %854, %cst_300 {dimension_numbers = #tpu.dot_dimension_numbers<[1], [1], [0], [0], [0, 0, 1, 0], [], []>} : vector<2x2xf32>, vector<8x2xf32>, vector<2x8xf32> -> vector<2x8xf32>
      %c0_301 = arith.constant 0 : index
      %c0_302 = arith.constant 0 : index
      %856 = vector.load %arg18[%c0_301, %c0_302] : memref<2x8xf32, #tpu.memory_space<vmem>>, vector<2x8xf32>
      tpu.vector_store %arg18[%c0_301, %c0_302], %855 {strides = array<i32>} : memref<2x8xf32, #tpu.memory_space<vmem>>, vector<2x8xf32>,
    } else {
    }
    %c8_i32 = arith.constant 8 : i32
    %3 = arith.muli %arg1, %c8_i32 : i32
    %4 = tpu.assume_multiple %3, 8 : i32
    %5 = arith.index_cast %4 : i32 to index
    %c0 = arith.constant 0 : index
    %6 = vector.load %arg19[%5, %c0] : memref<8x32xf32, #tpu.memory_space<vmem>>, vector<8x32xf32>
    %7 = arith.index_cast %4 : i32 to index
    %c0_1 = arith.constant 0 : index
    %8 = vector.load %arg15[%7, %c0_1] : memref<8x32xf32, #tpu.memory_space<vmem>>, vector<8x32xf32>
    %9 = arith.index_cast %4 : i32 to index
    %c0_2 = arith.constant 0 : index
    %10 = vector.load %arg16[%9, %c0_2] : memref<8x2xf32, #tpu.memory_space<vmem>>, vector<8x2xf32>
    %c0_3 = arith.constant 0 : index
    %c0_4 = arith.constant 0 : index
    %11 = vector.load %arg20[%c0_3, %c0_4] : memref<8x32xf32, #tpu.memory_space<vmem>>, vector<8x32xf32>
    %c0_5 = arith.constant 0 : index
    %c0_6 = arith.constant 0 : index
    %12 = vector.load %arg21[%c0_5, %c0_6] : memref<8x32xf32, #tpu.memory_space<vmem>>, vector<8x32xf32>
    %c0_7 = arith.constant 0 : index
    %c0_8 = arith.constant 0 : index
    %13 = vector.load %arg16[%c0_7, %c0_8] : memref<8x2xf32, #tpu.memory_space<vmem>>, vector<8x2xf32>
    %cst = arith.constant dense<0.000000e+00> : vector<8x8xf32>
    %14 = tpu.matmul %6, %11, %cst {dimension_numbers = #tpu.dot_dimension_numbers<[1], [1], [0], [0], [0, 0, 1, 0], [], []>} : vector<8x32xf32>, vector<8x32xf32>, vector<8x8xf32> -> vector<8x8xf32>
    %cst_9 = arith.constant dense<0xFF800000> : vector<8xf32>
    %15 = vector.multi_reduction <maximumf>, %14, %cst_9 [1] : vector<8x8xf32> to vector<8xf32>
    %16 = vector.shape_cast %15 : vector<8xf32> to vector<8x1xf32>
    %17 = vector.broadcast %16 : vector<8x1xf32> to vector<8x8xf32>
    %18 = arith.subf %14, %17 : vector<8x8xf32>
    %19 = math.exp %18 : vector<8x8xf32>
    %cst_10 = arith.constant dense<0.000000e+00> : vector<8xf32>
    %20 = vector.multi_reduction <add>, %19, %cst_10 [1] : vector<8x8xf32> to vector<8xf32>
    %21 = vector.shape_cast %20 : vector<8xf32> to vector<8x1xf32>
    %22 = tpu.reciprocal %21 {approx = true} : vector<8x1xf32> -> vector<8x1xf32>
    %23 = vector.broadcast %22 : vector<8x1xf32> to vector<8x8xf32>
    %24 = arith.mulf %19, %23 : vector<8x8xf32>
    %cst_11 = arith.constant dense<0.000000e+00> : vector<8x32xf32>
    %25 = tpu.matmul %24, %12, %cst_11 {dimension_numbers = #tpu.dot_dimension_numbers<[1], [0], [0], [1], [0, 0, 1, 1], [], []>} : vector<8x8xf32>, vector<8x32xf32>, vector<8x32xf32> -> vector<8x32xf32>
    %26 = arith.addf %8, %25 : vector<8x32xf32>
    %27 = vector.extract_strided_slice %10 {offsets = [0, 0], sizes = [8, 1], strides = [1, 1]} : vector<8x2xf32> to vector<8x1xf32>
    %28 = vector.extract_strided_slice %10 {offsets = [0, 1], sizes = [8, 1], strides = [1, 1]} : vector<8x2xf32> to vector<8x1xf32>
    %c0_12 = arith.constant 0 : index
    %c0_13 = arith.constant 0 : index
    %29 = vector.load %arg18[%c0_12, %c0_13] : memref<2x8xf32, #tpu.memory_space<vmem>>, vector<1x8xf32>
    %c1 = arith.constant 1 : index
    %c0_14 = arith.constant 0 : index
    %30 = vector.load %arg18[%c1, %c0_14] : memref<2x8xf32, #tpu.memory_space<vmem>>, vector<1x8xf32>
    %31 = vector.broadcast %27 : vector<8x1xf32> to vector<8x8xf32>
    %32 = vector.broadcast %29 : vector<1x8xf32> to vector<8x8xf32>
    %33 = arith.subf %31, %32 : vector<8x8xf32>
    %34 = vector.broadcast %28 : vector<8x1xf32> to vector<8x8xf32>
    %35 = vector.broadcast %30 : vector<1x8xf32> to vector<8x8xf32>
    %36 = arith.subf %34, %35 : vector<8x8xf32>
    %c5_i32 = arith.constant 5 : i32
    %37 = arith.muli %c5_i32, %arg0 : i32
    %c4_i32 = arith.constant 4 : i32
    %38 = arith.addi %37, %c4_i32 : i32
    %39 = arith.index_cast %38 : i32 to index
    %c0_15 = arith.constant 0 : index
    %40 = memref.load %arg2[%39, %c0_15] : memref<15x32xf32, #tpu.memory_space<smem>>
    %cst_16 = arith.constant 0.000000e+00 : f32
    %41 = vector.broadcast %cst_16 : f32 to vector<8x8xf32>
    %42 = vector.broadcast %40 : f32 to vector<8x8xf32>
    %43 = arith.addf %41, %42 : vector<8x8xf32>
    %c0_i32_17 = arith.constant 0 : i32
    %44 = arith.addi %37, %c0_i32_17 : i32
    %45 = arith.index_cast %44 : i32 to index
    %c0_18 = arith.constant 0 : index
    %46 = memref.load %arg2[%45, %c0_18] : memref<15x32xf32, #tpu.memory_space<smem>>
    %c1_i32 = arith.constant 1 : i32
    %47 = arith.addi %37, %c1_i32 : i32
    %48 = arith.index_cast %47 : i32 to index
    %c0_19 = arith.constant 0 : index
    %49 = memref.load %arg2[%48, %c0_19] : memref<15x32xf32, #tpu.memory_space<smem>>
    %c2_i32 = arith.constant 2 : i32
    %50 = arith.addi %37, %c2_i32 : i32
    %51 = arith.index_cast %50 : i32 to index
    %c0_20 = arith.constant 0 : index
    %52 = memref.load %arg2[%51, %c0_20] : memref<15x32xf32, #tpu.memory_space<smem>>
    %c3_i32 = arith.constant 3 : i32
    %53 = arith.addi %37, %c3_i32 : i32
    %54 = arith.index_cast %53 : i32 to index
    %c0_21 = arith.constant 0 : index
    %55 = memref.load %arg2[%54, %c0_21] : memref<15x32xf32, #tpu.memory_space<smem>>
    %56 = vector.broadcast %46 : f32 to vector<8x8xf32>
    %57 = arith.mulf %33, %56 : vector<8x8xf32>
    %58 = vector.broadcast %49 : f32 to vector<8x8xf32>
    %59 = arith.mulf %36, %58 : vector<8x8xf32>
    %60 = arith.addf %57, %59 : vector<8x8xf32>
    %61 = vector.broadcast %52 : f32 to vector<8x8xf32>
    %62 = arith.addf %60, %61 : vector<8x8xf32>
    %cst_22 = arith.constant 0.000000e+00 : f32
    %63 = vector.broadcast %cst_22 : f32 to vector<8x8xf32>
    %64 = arith.maximumf %62, %63 : vector<8x8xf32>
    %65 = vector.broadcast %55 : f32 to vector<8x8xf32>
    %66 = arith.mulf %64, %65 : vector<8x8xf32>
    %67 = arith.addf %43, %66 : vector<8x8xf32>
    %c0_i32_23 = arith.constant 0 : i32
    %68 = arith.addi %37, %c0_i32_23 : i32
    %69 = arith.index_cast %68 : i32 to index
    %c1_24 = arith.constant 1 : index
    %70 = memref.load %arg2[%69, %c1_24] : memref<15x32xf32, #tpu.memory_space<smem>>
    %c1_i32_25 = arith.constant 1 : i32
    %71 = arith.addi %37, %c1_i32_25 : i32
    %72 = arith.index_cast %71 : i32 to index
    %c1_26 = arith.constant 1 : index
    %73 = memref.load %arg2[%72, %c1_26] : memref<15x32xf32, #tpu.memory_space<smem>>
    %c2_i32_27 = arith.constant 2 : i32
    %74 = arith.addi %37, %c2_i32_27 : i32
    %75 = arith.index_cast %74 : i32 to index
    %c1_28 = arith.constant 1 : index
    %76 = memref.load %arg2[%75, %c1_28] : memref<15x32xf32, #tpu.memory_space<smem>>
    %c3_i32_29 = arith.constant 3 : i32
    %77 = arith.addi %37, %c3_i32_29 : i32
    %78 = arith.index_cast %77 : i32 to index
    %c1_30 = arith.constant 1 : index
    %79 = memref.load %arg2[%78, %c1_30] : memref<15x32xf32, #tpu.memory_space<smem>>
    %80 = vector.broadcast %70 : f32 to vector<8x8xf32>
    %81 = arith.mulf %33, %80 : vector<8x8xf32>
    %82 = vector.broadcast %73 : f32 to vector<8x8xf32>
    %83 = arith.mulf %36, %82 : vector<8x8xf32>
    %84 = arith.addf %81, %83 : vector<8x8xf32>
    %85 = vector.broadcast %76 : f32 to vector<8x8xf32>
    %86 = arith.addf %84, %85 : vector<8x8xf32>
    %cst_31 = arith.constant 0.000000e+00 : f32
    %87 = vector.broadcast %cst_31 : f32 to vector<8x8xf32>
    %88 = arith.maximumf %86, %87 : vector<8x8xf32>
    %89 = vector.broadcast %79 : f32 to vector<8x8xf32>
    %90 = arith.mulf %88, %89 : vector<8x8xf32>
    %91 = arith.addf %67, %90 : vector<8x8xf32>
    %c0_i32_32 = arith.constant 0 : i32
    %92 = arith.addi %37, %c0_i32_32 : i32
    %93 = arith.index_cast %92 : i32 to index
    %c2 = arith.constant 2 : index
    %94 = memref.load %arg2[%93, %c2] : memref<15x32xf32, #tpu.memory_space<smem>>
    %c1_i32_33 = arith.constant 1 : i32
    %95 = arith.addi %37, %c1_i32_33 : i32
    %96 = arith.index_cast %95 : i32 to index
    %c2_34 = arith.constant 2 : index
    %97 = memref.load %arg2[%96, %c2_34] : memref<15x32xf32, #tpu.memory_space<smem>>
    %c2_i32_35 = arith.constant 2 : i32
    %98 = arith.addi %37, %c2_i32_35 : i32
    %99 = arith.index_cast %98 : i32 to index
    %c2_36 = arith.constant 2 : index
    %100 = memref.load %arg2[%99, %c2_36] : memref<15x32xf32, #tpu.memory_space<smem>>
    %c3_i32_37 = arith.constant 3 : i32
    %101 = arith.addi %37, %c3_i32_37 : i32
    %102 = arith.index_cast %101 : i32 to index
    %c2_38 = arith.constant 2 : index
    %103 = memref.load %arg2[%102, %c2_38] : memref<15x32xf32, #tpu.memory_space<smem>>
    %104 = vector.broadcast %94 : f32 to vector<8x8xf32>
    %105 = arith.mulf %33, %104 : vector<8x8xf32>
    %106 = vector.broadcast %97 : f32 to vector<8x8xf32>
    %107 = arith.mulf %36, %106 : vector<8x8xf32>
    %108 = arith.addf %105, %107 : vector<8x8xf32>
    %109 = vector.broadcast %100 : f32 to vector<8x8xf32>
    %110 = arith.addf %108, %109 : vector<8x8xf32>
    %cst_39 = arith.constant 0.000000e+00 : f32
    %111 = vector.broadcast %cst_39 : f32 to vector<8x8xf32>
    %112 = arith.maximumf %110, %111 : vector<8x8xf32>
    %113 = vector.broadcast %103 : f32 to vector<8x8xf32>
    %114 = arith.mulf %112, %113 : vector<8x8xf32>
    %115 = arith.addf %91, %114 : vector<8x8xf32>
    %c0_i32_40 = arith.constant 0 : i32
    %116 = arith.addi %37, %c0_i32_40 : i32
    %117 = arith.index_cast %116 : i32 to index
    %c3 = arith.constant 3 : index
    %118 = memref.load %arg2[%117, %c3] : memref<15x32xf32, #tpu.memory_space<smem>>
    %c1_i32_41 = arith.constant 1 : i32
    %119 = arith.addi %37, %c1_i32_41 : i32
    %120 = arith.index_cast %119 : i32 to index
    %c3_42 = arith.constant 3 : index
    %121 = memref.load %arg2[%120, %c3_42] : memref<15x32xf32, #tpu.memory_space<smem>>
    %c2_i32_43 = arith.constant 2 : i32
    %122 = arith.addi %37, %c2_i32_43 : i32
    %123 = arith.index_cast %122 : i32 to index
    %c3_44 = arith.constant 3 : index
    %124 = memref.load %arg2[%123, %c3_44] : memref<15x32xf32, #tpu.memory_space<smem>>
    %c3_i32_45 = arith.constant 3 : i32
    %125 = arith.addi %37, %c3_i32_45 : i32
    %126 = arith.index_cast %125 : i32 to index
    %c3_46 = arith.constant 3 : index
    %127 = memref.load %arg2[%126, %c3_46] : memref<15x32xf32, #tpu.memory_space<smem>>
    %128 = vector.broadcast %118 : f32 to vector<8x8xf32>
    %129 = arith.mulf %33, %128 : vector<8x8xf32>
    %130 = vector.broadcast %121 : f32 to vector<8x8xf32>
    %131 = arith.mulf %36, %130 : vector<8x8xf32>
    %132 = arith.addf %129, %131 : vector<8x8xf32>
    %133 = vector.broadcast %124 : f32 to vector<8x8xf32>
    %134 = arith.addf %132, %133 : vector<8x8xf32>
    %cst_47 = arith.constant 0.000000e+00 : f32
    %135 = vector.broadcast %cst_47 : f32 to vector<8x8xf32>
    %136 = arith.maximumf %134, %135 : vector<8x8xf32>
    %137 = vector.broadcast %127 : f32 to vector<8x8xf32>
    %138 = arith.mulf %136, %137 : vector<8x8xf32>
    %139 = arith.addf %115, %138 : vector<8x8xf32>
    %c0_i32_48 = arith.constant 0 : i32
    %140 = arith.addi %37, %c0_i32_48 : i32
    %141 = arith.index_cast %140 : i32 to index
    %c4 = arith.constant 4 : index
    %142 = memref.load %arg2[%141, %c4] : memref<15x32xf32, #tpu.memory_space<smem>>
    %c1_i32_49 = arith.constant 1 : i32
    %143 = arith.addi %37, %c1_i32_49 : i32
    %144 = arith.index_cast %143 : i32 to index
    %c4_50 = arith.constant 4 : index
    %145 = memref.load %arg2[%144, %c4_50] : memref<15x32xf32, #tpu.memory_space<smem>>
    %c2_i32_51 = arith.constant 2 : i32
    %146 = arith.addi %37, %c2_i32_51 : i32
    %147 = arith.index_cast %146 : i32 to index
    %c4_52 = arith.constant 4 : index
    %148 = memref.load %arg2[%147, %c4_52] : memref<15x32xf32, #tpu.memory_space<smem>>
    %c3_i32_53 = arith.constant 3 : i32
    %149 = arith.addi %37, %c3_i32_53 : i32
    %150 = arith.index_cast %149 : i32 to index
    %c4_54 = arith.constant 4 : index
    %151 = memref.load %arg2[%150, %c4_54] : memref<15x32xf32, #tpu.memory_space<smem>>
    %152 = vector.broadcast %142 : f32 to vector<8x8xf32>
    %153 = arith.mulf %33, %152 : vector<8x8xf32>
    %154 = vector.broadcast %145 : f32 to vector<8x8xf32>
    %155 = arith.mulf %36, %154 : vector<8x8xf32>
    %156 = arith.addf %153, %155 : vector<8x8xf32>
    %157 = vector.broadcast %148 : f32 to vector<8x8xf32>
    %158 = arith.addf %156, %157 : vector<8x8xf32>
    %cst_55 = arith.constant 0.000000e+00 : f32
    %159 = vector.broadcast %cst_55 : f32 to vector<8x8xf32>
    %160 = arith.maximumf %158, %159 : vector<8x8xf32>
    %161 = vector.broadcast %151 : f32 to vector<8x8xf32>
    %162 = arith.mulf %160, %161 : vector<8x8xf32>
    %163 = arith.addf %139, %162 : vector<8x8xf32>
    %c0_i32_56 = arith.constant 0 : i32
    %164 = arith.addi %37, %c0_i32_56 : i32
    %165 = arith.index_cast %164 : i32 to index
    %c5 = arith.constant 5 : index
    %166 = memref.load %arg2[%165, %c5] : memref<15x32xf32, #tpu.memory_space<smem>>
    %c1_i32_57 = arith.constant 1 : i32
    %167 = arith.addi %37, %c1_i32_57 : i32
    %168 = arith.index_cast %167 : i32 to index
    %c5_58 = arith.constant 5 : index
    %169 = memref.load %arg2[%168, %c5_58] : memref<15x32xf32, #tpu.memory_space<smem>>
    %c2_i32_59 = arith.constant 2 : i32
    %170 = arith.addi %37, %c2_i32_59 : i32
    %171 = arith.index_cast %170 : i32 to index
    %c5_60 = arith.constant 5 : index
    %172 = memref.load %arg2[%171, %c5_60] : memref<15x32xf32, #tpu.memory_space<smem>>
    %c3_i32_61 = arith.constant 3 : i32
    %173 = arith.addi %37, %c3_i32_61 : i32
    %174 = arith.index_cast %173 : i32 to index
    %c5_62 = arith.constant 5 : index
    %175 = memref.load %arg2[%174, %c5_62] : memref<15x32xf32, #tpu.memory_space<smem>>
    %176 = vector.broadcast %166 : f32 to vector<8x8xf32>
    %177 = arith.mulf %33, %176 : vector<8x8xf32>
    %178 = vector.broadcast %169 : f32 to vector<8x8xf32>
    %179 = arith.mulf %36, %178 : vector<8x8xf32>
    %180 = arith.addf %177, %179 : vector<8x8xf32>
    %181 = vector.broadcast %172 : f32 to vector<8x8xf32>
    %182 = arith.addf %180, %181 : vector<8x8xf32>
    %cst_63 = arith.constant 0.000000e+00 : f32
    %183 = vector.broadcast %cst_63 : f32 to vector<8x8xf32>
    %184 = arith.maximumf %182, %183 : vector<8x8xf32>
    %185 = vector.broadcast %175 : f32 to vector<8x8xf32>
    %186 = arith.mulf %184, %185 : vector<8x8xf32>
    %187 = arith.addf %163, %186 : vector<8x8xf32>
    %c0_i32_64 = arith.constant 0 : i32
    %188 = arith.addi %37, %c0_i32_64 : i32
    %189 = arith.index_cast %188 : i32 to index
    %c6 = arith.constant 6 : index
    %190 = memref.load %arg2[%189, %c6] : memref<15x32xf32, #tpu.memory_space<smem>>
    %c1_i32_65 = arith.constant 1 : i32
    %191 = arith.addi %37, %c1_i32_65 : i32
    %192 = arith.index_cast %191 : i32 to index
    %c6_66 = arith.constant 6 : index
    %193 = memref.load %arg2[%192, %c6_66] : memref<15x32xf32, #tpu.memory_space<smem>>
    %c2_i32_67 = arith.constant 2 : i32
    %194 = arith.addi %37, %c2_i32_67 : i32
    %195 = arith.index_cast %194 : i32 to index
    %c6_68 = arith.constant 6 : index
    %196 = memref.load %arg2[%195, %c6_68] : memref<15x32xf32, #tpu.memory_space<smem>>
    %c3_i32_69 = arith.constant 3 : i32
    %197 = arith.addi %37, %c3_i32_69 : i32
    %198 = arith.index_cast %197 : i32 to index
    %c6_70 = arith.constant 6 : index
    %199 = memref.load %arg2[%198, %c6_70] : memref<15x32xf32, #tpu.memory_space<smem>>
    %200 = vector.broadcast %190 : f32 to vector<8x8xf32>
    %201 = arith.mulf %33, %200 : vector<8x8xf32>
    %202 = vector.broadcast %193 : f32 to vector<8x8xf32>
    %203 = arith.mulf %36, %202 : vector<8x8xf32>
    %204 = arith.addf %201, %203 : vector<8x8xf32>
    %205 = vector.broadcast %196 : f32 to vector<8x8xf32>
    %206 = arith.addf %204, %205 : vector<8x8xf32>
    %cst_71 = arith.constant 0.000000e+00 : f32
    %207 = vector.broadcast %cst_71 : f32 to vector<8x8xf32>
    %208 = arith.maximumf %206, %207 : vector<8x8xf32>
    %209 = vector.broadcast %199 : f32 to vector<8x8xf32>
    %210 = arith.mulf %208, %209 : vector<8x8xf32>
    %211 = arith.addf %187, %210 : vector<8x8xf32>
    %c0_i32_72 = arith.constant 0 : i32
    %212 = arith.addi %37, %c0_i32_72 : i32
    %213 = arith.index_cast %212 : i32 to index
    %c7 = arith.constant 7 : index
    %214 = memref.load %arg2[%213, %c7] : memref<15x32xf32, #tpu.memory_space<smem>>
    %c1_i32_73 = arith.constant 1 : i32
    %215 = arith.addi %37, %c1_i32_73 : i32
    %216 = arith.index_cast %215 : i32 to index
    %c7_74 = arith.constant 7 : index
    %217 = memref.load %arg2[%216, %c7_74] : memref<15x32xf32, #tpu.memory_space<smem>>
    %c2_i32_75 = arith.constant 2 : i32
    %218 = arith.addi %37, %c2_i32_75 : i32
    %219 = arith.index_cast %218 : i32 to index
    %c7_76 = arith.constant 7 : index
    %220 = memref.load %arg2[%219, %c7_76] : memref<15x32xf32, #tpu.memory_space<smem>>
    %c3_i32_77 = arith.constant 3 : i32
    %221 = arith.addi %37, %c3_i32_77 : i32
    %222 = arith.index_cast %221 : i32 to index
    %c7_78 = arith.constant 7 : index
    %223 = memref.load %arg2[%222, %c7_78] : memref<15x32xf32, #tpu.memory_space<smem>>
    %224 = vector.broadcast %214 : f32 to vector<8x8xf32>
    %225 = arith.mulf %33, %224 : vector<8x8xf32>
    %226 = vector.broadcast %217 : f32 to vector<8x8xf32>
    %227 = arith.mulf %36, %226 : vector<8x8xf32>
    %228 = arith.addf %225, %227 : vector<8x8xf32>
    %229 = vector.broadcast %220 : f32 to vector<8x8xf32>
    %230 = arith.addf %228, %229 : vector<8x8xf32>
    %cst_79 = arith.constant 0.000000e+00 : f32
    %231 = vector.broadcast %cst_79 : f32 to vector<8x8xf32>
    %232 = arith.maximumf %230, %231 : vector<8x8xf32>
    %233 = vector.broadcast %223 : f32 to vector<8x8xf32>
    %234 = arith.mulf %232, %233 : vector<8x8xf32>
    %235 = arith.addf %211, %234 : vector<8x8xf32>
    %c0_i32_80 = arith.constant 0 : i32
    %236 = arith.addi %37, %c0_i32_80 : i32
    %237 = arith.index_cast %236 : i32 to index
    %c8 = arith.constant 8 : index
    %238 = memref.load %arg2[%237, %c8] : memref<15x32xf32, #tpu.memory_space<smem>>
    %c1_i32_81 = arith.constant 1 : i32
    %239 = arith.addi %37, %c1_i32_81 : i32
    %240 = arith.index_cast %239 : i32 to index
    %c8_82 = arith.constant 8 : index
    %241 = memref.load %arg2[%240, %c8_82] : memref<15x32xf32, #tpu.memory_space<smem>>
    %c2_i32_83 = arith.constant 2 : i32
    %242 = arith.addi %37, %c2_i32_83 : i32
    %243 = arith.index_cast %242 : i32 to index
    %c8_84 = arith.constant 8 : index
    %244 = memref.load %arg2[%243, %c8_84] : memref<15x32xf32, #tpu.memory_space<smem>>
    %c3_i32_85 = arith.constant 3 : i32
    %245 = arith.addi %37, %c3_i32_85 : i32
    %246 = arith.index_cast %245 : i32 to index
    %c8_86 = arith.constant 8 : index
    %247 = memref.load %arg2[%246, %c8_86] : memref<15x32xf32, #tpu.memory_space<smem>>
    %248 = vector.broadcast %238 : f32 to vector<8x8xf32>
    %249 = arith.mulf %33, %248 : vector<8x8xf32>
    %250 = vector.broadcast %241 : f32 to vector<8x8xf32>
    %251 = arith.mulf %36, %250 : vector<8x8xf32>
    %252 = arith.addf %249, %251 : vector<8x8xf32>
    %253 = vector.broadcast %244 : f32 to vector<8x8xf32>
    %254 = arith.addf %252, %253 : vector<8x8xf32>
    %cst_87 = arith.constant 0.000000e+00 : f32
    %255 = vector.broadcast %cst_87 : f32 to vector<8x8xf32>
    %256 = arith.maximumf %254, %255 : vector<8x8xf32>
    %257 = vector.broadcast %247 : f32 to vector<8x8xf32>
    %258 = arith.mulf %256, %257 : vector<8x8xf32>
    %259 = arith.addf %235, %258 : vector<8x8xf32>
    %c0_i32_88 = arith.constant 0 : i32
    %260 = arith.addi %37, %c0_i32_88 : i32
    %261 = arith.index_cast %260 : i32 to index
    %c9 = arith.constant 9 : index
    %262 = memref.load %arg2[%261, %c9] : memref<15x32xf32, #tpu.memory_space<smem>>
    %c1_i32_89 = arith.constant 1 : i32
    %263 = arith.addi %37, %c1_i32_89 : i32
    %264 = arith.index_cast %263 : i32 to index
    %c9_90 = arith.constant 9 : index
    %265 = memref.load %arg2[%264, %c9_90] : memref<15x32xf32, #tpu.memory_space<smem>>
    %c2_i32_91 = arith.constant 2 : i32
    %266 = arith.addi %37, %c2_i32_91 : i32
    %267 = arith.index_cast %266 : i32 to index
    %c9_92 = arith.constant 9 : index
    %268 = memref.load %arg2[%267, %c9_92] : memref<15x32xf32, #tpu.memory_space<smem>>
    %c3_i32_93 = arith.constant 3 : i32
    %269 = arith.addi %37, %c3_i32_93 : i32
    %270 = arith.index_cast %269 : i32 to index
    %c9_94 = arith.constant 9 : index
    %271 = memref.load %arg2[%270, %c9_94] : memref<15x32xf32, #tpu.memory_space<smem>>
    %272 = vector.broadcast %262 : f32 to vector<8x8xf32>
    %273 = arith.mulf %33, %272 : vector<8x8xf32>
    %274 = vector.broadcast %265 : f32 to vector<8x8xf32>
    %275 = arith.mulf %36, %274 : vector<8x8xf32>
    %276 = arith.addf %273, %275 : vector<8x8xf32>
    %277 = vector.broadcast %268 : f32 to vector<8x8xf32>
    %278 = arith.addf %276, %277 : vector<8x8xf32>
    %cst_95 = arith.constant 0.000000e+00 : f32
    %279 = vector.broadcast %cst_95 : f32 to vector<8x8xf32>
    %280 = arith.maximumf %278, %279 : vector<8x8xf32>
    %281 = vector.broadcast %271 : f32 to vector<8x8xf32>
    %282 = arith.mulf %280, %281 : vector<8x8xf32>
    %283 = arith.addf %259, %282 : vector<8x8xf32>
    %c0_i32_96 = arith.constant 0 : i32
    %284 = arith.addi %37, %c0_i32_96 : i32
    %285 = arith.index_cast %284 : i32 to index
    %c10 = arith.constant 10 : index
    %286 = memref.load %arg2[%285, %c10] : memref<15x32xf32, #tpu.memory_space<smem>>
    %c1_i32_97 = arith.constant 1 : i32
    %287 = arith.addi %37, %c1_i32_97 : i32
    %288 = arith.index_cast %287 : i32 to index
    %c10_98 = arith.constant 10 : index
    %289 = memref.load %arg2[%288, %c10_98] : memref<15x32xf32, #tpu.memory_space<smem>>
    %c2_i32_99 = arith.constant 2 : i32
    %290 = arith.addi %37, %c2_i32_99 : i32
    %291 = arith.index_cast %290 : i32 to index
    %c10_100 = arith.constant 10 : index
    %292 = memref.load %arg2[%291, %c10_100] : memref<15x32xf32, #tpu.memory_space<smem>>
    %c3_i32_101 = arith.constant 3 : i32
    %293 = arith.addi %37, %c3_i32_101 : i32
    %294 = arith.index_cast %293 : i32 to index
    %c10_102 = arith.constant 10 : index
    %295 = memref.load %arg2[%294, %c10_102] : memref<15x32xf32, #tpu.memory_space<smem>>
    %296 = vector.broadcast %286 : f32 to vector<8x8xf32>
    %297 = arith.mulf %33, %296 : vector<8x8xf32>
    %298 = vector.broadcast %289 : f32 to vector<8x8xf32>
    %299 = arith.mulf %36, %298 : vector<8x8xf32>
    %300 = arith.addf %297, %299 : vector<8x8xf32>
    %301 = vector.broadcast %292 : f32 to vector<8x8xf32>
    %302 = arith.addf %300, %301 : vector<8x8xf32>
    %cst_103 = arith.constant 0.000000e+00 : f32
    %303 = vector.broadcast %cst_103 : f32 to vector<8x8xf32>
    %304 = arith.maximumf %302, %303 : vector<8x8xf32>
    %305 = vector.broadcast %295 : f32 to vector<8x8xf32>
    %306 = arith.mulf %304, %305 : vector<8x8xf32>
    %307 = arith.addf %283, %306 : vector<8x8xf32>
    %c0_i32_104 = arith.constant 0 : i32
    %308 = arith.addi %37, %c0_i32_104 : i32
    %309 = arith.index_cast %308 : i32 to index
    %c11 = arith.constant 11 : index
    %310 = memref.load %arg2[%309, %c11] : memref<15x32xf32, #tpu.memory_space<smem>>
    %c1_i32_105 = arith.constant 1 : i32
    %311 = arith.addi %37, %c1_i32_105 : i32
    %312 = arith.index_cast %311 : i32 to index
    %c11_106 = arith.constant 11 : index
    %313 = memref.load %arg2[%312, %c11_106] : memref<15x32xf32, #tpu.memory_space<smem>>
    %c2_i32_107 = arith.constant 2 : i32
    %314 = arith.addi %37, %c2_i32_107 : i32
    %315 = arith.index_cast %314 : i32 to index
    %c11_108 = arith.constant 11 : index
    %316 = memref.load %arg2[%315, %c11_108] : memref<15x32xf32, #tpu.memory_space<smem>>
    %c3_i32_109 = arith.constant 3 : i32
    %317 = arith.addi %37, %c3_i32_109 : i32
    %318 = arith.index_cast %317 : i32 to index
    %c11_110 = arith.constant 11 : index
    %319 = memref.load %arg2[%318, %c11_110] : memref<15x32xf32, #tpu.memory_space<smem>>
    %320 = vector.broadcast %310 : f32 to vector<8x8xf32>
    %321 = arith.mulf %33, %320 : vector<8x8xf32>
    %322 = vector.broadcast %313 : f32 to vector<8x8xf32>
    %323 = arith.mulf %36, %322 : vector<8x8xf32>
    %324 = arith.addf %321, %323 : vector<8x8xf32>
    %325 = vector.broadcast %316 : f32 to vector<8x8xf32>
    %326 = arith.addf %324, %325 : vector<8x8xf32>
    %cst_111 = arith.constant 0.000000e+00 : f32
    %327 = vector.broadcast %cst_111 : f32 to vector<8x8xf32>
    %328 = arith.maximumf %326, %327 : vector<8x8xf32>
    %329 = vector.broadcast %319 : f32 to vector<8x8xf32>
    %330 = arith.mulf %328, %329 : vector<8x8xf32>
    %331 = arith.addf %307, %330 : vector<8x8xf32>
    %c0_i32_112 = arith.constant 0 : i32
    %332 = arith.addi %37, %c0_i32_112 : i32
    %333 = arith.index_cast %332 : i32 to index
    %c12 = arith.constant 12 : index
    %334 = memref.load %arg2[%333, %c12] : memref<15x32xf32, #tpu.memory_space<smem>>
    %c1_i32_113 = arith.constant 1 : i32
    %335 = arith.addi %37, %c1_i32_113 : i32
    %336 = arith.index_cast %335 : i32 to index
    %c12_114 = arith.constant 12 : index
    %337 = memref.load %arg2[%336, %c12_114] : memref<15x32xf32, #tpu.memory_space<smem>>
    %c2_i32_115 = arith.constant 2 : i32
    %338 = arith.addi %37, %c2_i32_115 : i32
    %339 = arith.index_cast %338 : i32 to index
    %c12_116 = arith.constant 12 : index
    %340 = memref.load %arg2[%339, %c12_116] : memref<15x32xf32, #tpu.memory_space<smem>>
    %c3_i32_117 = arith.constant 3 : i32
    %341 = arith.addi %37, %c3_i32_117 : i32
    %342 = arith.index_cast %341 : i32 to index
    %c12_118 = arith.constant 12 : index
    %343 = memref.load %arg2[%342, %c12_118] : memref<15x32xf32, #tpu.memory_space<smem>>
    %344 = vector.broadcast %334 : f32 to vector<8x8xf32>
    %345 = arith.mulf %33, %344 : vector<8x8xf32>
    %346 = vector.broadcast %337 : f32 to vector<8x8xf32>
    %347 = arith.mulf %36, %346 : vector<8x8xf32>
    %348 = arith.addf %345, %347 : vector<8x8xf32>
    %349 = vector.broadcast %340 : f32 to vector<8x8xf32>
    %350 = arith.addf %348, %349 : vector<8x8xf32>
    %cst_119 = arith.constant 0.000000e+00 : f32
    %351 = vector.broadcast %cst_119 : f32 to vector<8x8xf32>
    %352 = arith.maximumf %350, %351 : vector<8x8xf32>
    %353 = vector.broadcast %343 : f32 to vector<8x8xf32>
    %354 = arith.mulf %352, %353 : vector<8x8xf32>
    %355 = arith.addf %331, %354 : vector<8x8xf32>
    %c0_i32_120 = arith.constant 0 : i32
    %356 = arith.addi %37, %c0_i32_120 : i32
    %357 = arith.index_cast %356 : i32 to index
    %c13 = arith.constant 13 : index
    %358 = memref.load %arg2[%357, %c13] : memref<15x32xf32, #tpu.memory_space<smem>>
    %c1_i32_121 = arith.constant 1 : i32
    %359 = arith.addi %37, %c1_i32_121 : i32
    %360 = arith.index_cast %359 : i32 to index
    %c13_122 = arith.constant 13 : index
    %361 = memref.load %arg2[%360, %c13_122] : memref<15x32xf32, #tpu.memory_space<smem>>
    %c2_i32_123 = arith.constant 2 : i32
    %362 = arith.addi %37, %c2_i32_123 : i32
    %363 = arith.index_cast %362 : i32 to index
    %c13_124 = arith.constant 13 : index
    %364 = memref.load %arg2[%363, %c13_124] : memref<15x32xf32, #tpu.memory_space<smem>>
    %c3_i32_125 = arith.constant 3 : i32
    %365 = arith.addi %37, %c3_i32_125 : i32
    %366 = arith.index_cast %365 : i32 to index
    %c13_126 = arith.constant 13 : index
    %367 = memref.load %arg2[%366, %c13_126] : memref<15x32xf32, #tpu.memory_space<smem>>
    %368 = vector.broadcast %358 : f32 to vector<8x8xf32>
    %369 = arith.mulf %33, %368 : vector<8x8xf32>
    %370 = vector.broadcast %361 : f32 to vector<8x8xf32>
    %371 = arith.mulf %36, %370 : vector<8x8xf32>
    %372 = arith.addf %369, %371 : vector<8x8xf32>
    %373 = vector.broadcast %364 : f32 to vector<8x8xf32>
    %374 = arith.addf %372, %373 : vector<8x8xf32>
    %cst_127 = arith.constant 0.000000e+00 : f32
    %375 = vector.broadcast %cst_127 : f32 to vector<8x8xf32>
    %376 = arith.maximumf %374, %375 : vector<8x8xf32>
    %377 = vector.broadcast %367 : f32 to vector<8x8xf32>
    %378 = arith.mulf %376, %377 : vector<8x8xf32>
    %379 = arith.addf %355, %378 : vector<8x8xf32>
    %c0_i32_128 = arith.constant 0 : i32
    %380 = arith.addi %37, %c0_i32_128 : i32
    %381 = arith.index_cast %380 : i32 to index
    %c14 = arith.constant 14 : index
    %382 = memref.load %arg2[%381, %c14] : memref<15x32xf32, #tpu.memory_space<smem>>
    %c1_i32_129 = arith.constant 1 : i32
    %383 = arith.addi %37, %c1_i32_129 : i32
    %384 = arith.index_cast %383 : i32 to index
    %c14_130 = arith.constant 14 : index
    %385 = memref.load %arg2[%384, %c14_130] : memref<15x32xf32, #tpu.memory_space<smem>>
    %c2_i32_131 = arith.constant 2 : i32
    %386 = arith.addi %37, %c2_i32_131 : i32
    %387 = arith.index_cast %386 : i32 to index
    %c14_132 = arith.constant 14 : index
    %388 = memref.load %arg2[%387, %c14_132] : memref<15x32xf32, #tpu.memory_space<smem>>
    %c3_i32_133 = arith.constant 3 : i32
    %389 = arith.addi %37, %c3_i32_133 : i32
    %390 = arith.index_cast %389 : i32 to index
    %c14_134 = arith.constant 14 : index
    %391 = memref.load %arg2[%390, %c14_134] : memref<15x32xf32, #tpu.memory_space<smem>>
    %392 = vector.broadcast %382 : f32 to vector<8x8xf32>
    %393 = arith.mulf %33, %392 : vector<8x8xf32>
    %394 = vector.broadcast %385 : f32 to vector<8x8xf32>
    %395 = arith.mulf %36, %394 : vector<8x8xf32>
    %396 = arith.addf %393, %395 : vector<8x8xf32>
    %397 = vector.broadcast %388 : f32 to vector<8x8xf32>
    %398 = arith.addf %396, %397 : vector<8x8xf32>
    %cst_135 = arith.constant 0.000000e+00 : f32
    %399 = vector.broadcast %cst_135 : f32 to vector<8x8xf32>
    %400 = arith.maximumf %398, %399 : vector<8x8xf32>
    %401 = vector.broadcast %391 : f32 to vector<8x8xf32>
    %402 = arith.mulf %400, %401 : vector<8x8xf32>
    %403 = arith.addf %379, %402 : vector<8x8xf32>
    %c0_i32_136 = arith.constant 0 : i32
    %404 = arith.addi %37, %c0_i32_136 : i32
    %405 = arith.index_cast %404 : i32 to index
    %c15 = arith.constant 15 : index
    %406 = memref.load %arg2[%405, %c15] : memref<15x32xf32, #tpu.memory_space<smem>>
    %c1_i32_137 = arith.constant 1 : i32
    %407 = arith.addi %37, %c1_i32_137 : i32
    %408 = arith.index_cast %407 : i32 to index
    %c15_138 = arith.constant 15 : index
    %409 = memref.load %arg2[%408, %c15_138] : memref<15x32xf32, #tpu.memory_space<smem>>
    %c2_i32_139 = arith.constant 2 : i32
    %410 = arith.addi %37, %c2_i32_139 : i32
    %411 = arith.index_cast %410 : i32 to index
    %c15_140 = arith.constant 15 : index
    %412 = memref.load %arg2[%411, %c15_140] : memref<15x32xf32, #tpu.memory_space<smem>>
    %c3_i32_141 = arith.constant 3 : i32
    %413 = arith.addi %37, %c3_i32_141 : i32
    %414 = arith.index_cast %413 : i32 to index
    %c15_142 = arith.constant 15 : index
    %415 = memref.load %arg2[%414, %c15_142] : memref<15x32xf32, #tpu.memory_space<smem>>
    %416 = vector.broadcast %406 : f32 to vector<8x8xf32>
    %417 = arith.mulf %33, %416 : vector<8x8xf32>
    %418 = vector.broadcast %409 : f32 to vector<8x8xf32>
    %419 = arith.mulf %36, %418 : vector<8x8xf32>
    %420 = arith.addf %417, %419 : vector<8x8xf32>
    %421 = vector.broadcast %412 : f32 to vector<8x8xf32>
    %422 = arith.addf %420, %421 : vector<8x8xf32>
    %cst_143 = arith.constant 0.000000e+00 : f32
    %423 = vector.broadcast %cst_143 : f32 to vector<8x8xf32>
    %424 = arith.maximumf %422, %423 : vector<8x8xf32>
    %425 = vector.broadcast %415 : f32 to vector<8x8xf32>
    %426 = arith.mulf %424, %425 : vector<8x8xf32>
    %427 = arith.addf %403, %426 : vector<8x8xf32>
    %c0_i32_144 = arith.constant 0 : i32
    %428 = arith.addi %37, %c0_i32_144 : i32
    %429 = arith.index_cast %428 : i32 to index
    %c16 = arith.constant 16 : index
    %430 = memref.load %arg2[%429, %c16] : memref<15x32xf32, #tpu.memory_space<smem>>
    %c1_i32_145 = arith.constant 1 : i32
    %431 = arith.addi %37, %c1_i32_145 : i32
    %432 = arith.index_cast %431 : i32 to index
    %c16_146 = arith.constant 16 : index
    %433 = memref.load %arg2[%432, %c16_146] : memref<15x32xf32, #tpu.memory_space<smem>>
    %c2_i32_147 = arith.constant 2 : i32
    %434 = arith.addi %37, %c2_i32_147 : i32
    %435 = arith.index_cast %434 : i32 to index
    %c16_148 = arith.constant 16 : index
    %436 = memref.load %arg2[%435, %c16_148] : memref<15x32xf32, #tpu.memory_space<smem>>
    %c3_i32_149 = arith.constant 3 : i32
    %437 = arith.addi %37, %c3_i32_149 : i32
    %438 = arith.index_cast %437 : i32 to index
    %c16_150 = arith.constant 16 : index
    %439 = memref.load %arg2[%438, %c16_150] : memref<15x32xf32, #tpu.memory_space<smem>>
    %440 = vector.broadcast %430 : f32 to vector<8x8xf32>
    %441 = arith.mulf %33, %440 : vector<8x8xf32>
    %442 = vector.broadcast %433 : f32 to vector<8x8xf32>
    %443 = arith.mulf %36, %442 : vector<8x8xf32>
    %444 = arith.addf %441, %443 : vector<8x8xf32>
    %445 = vector.broadcast %436 : f32 to vector<8x8xf32>
    %446 = arith.addf %444, %445 : vector<8x8xf32>
    %cst_151 = arith.constant 0.000000e+00 : f32
    %447 = vector.broadcast %cst_151 : f32 to vector<8x8xf32>
    %448 = arith.maximumf %446, %447 : vector<8x8xf32>
    %449 = vector.broadcast %439 : f32 to vector<8x8xf32>
    %450 = arith.mulf %448, %449 : vector<8x8xf32>
    %451 = arith.addf %427, %450 : vector<8x8xf32>
    %c0_i32_152 = arith.constant 0 : i32
    %452 = arith.addi %37, %c0_i32_152 : i32
    %453 = arith.index_cast %452 : i32 to index
    %c17 = arith.constant 17 : index
    %454 = memref.load %arg2[%453, %c17] : memref<15x32xf32, #tpu.memory_space<smem>>
    %c1_i32_153 = arith.constant 1 : i32
    %455 = arith.addi %37, %c1_i32_153 : i32
    %456 = arith.index_cast %455 : i32 to index
    %c17_154 = arith.constant 17 : index
    %457 = memref.load %arg2[%456, %c17_154] : memref<15x32xf32, #tpu.memory_space<smem>>
    %c2_i32_155 = arith.constant 2 : i32
    %458 = arith.addi %37, %c2_i32_155 : i32
    %459 = arith.index_cast %458 : i32 to index
    %c17_156 = arith.constant 17 : index
    %460 = memref.load %arg2[%459, %c17_156] : memref<15x32xf32, #tpu.memory_space<smem>>
    %c3_i32_157 = arith.constant 3 : i32
    %461 = arith.addi %37, %c3_i32_157 : i32
    %462 = arith.index_cast %461 : i32 to index
    %c17_158 = arith.constant 17 : index
    %463 = memref.load %arg2[%462, %c17_158] : memref<15x32xf32, #tpu.memory_space<smem>>
    %464 = vector.broadcast %454 : f32 to vector<8x8xf32>
    %465 = arith.mulf %33, %464 : vector<8x8xf32>
    %466 = vector.broadcast %457 : f32 to vector<8x8xf32>
    %467 = arith.mulf %36, %466 : vector<8x8xf32>
    %468 = arith.addf %465, %467 : vector<8x8xf32>
    %469 = vector.broadcast %460 : f32 to vector<8x8xf32>
    %470 = arith.addf %468, %469 : vector<8x8xf32>
    %cst_159 = arith.constant 0.000000e+00 : f32
    %471 = vector.broadcast %cst_159 : f32 to vector<8x8xf32>
    %472 = arith.maximumf %470, %471 : vector<8x8xf32>
    %473 = vector.broadcast %463 : f32 to vector<8x8xf32>
    %474 = arith.mulf %472, %473 : vector<8x8xf32>
    %475 = arith.addf %451, %474 : vector<8x8xf32>
    %c0_i32_160 = arith.constant 0 : i32
    %476 = arith.addi %37, %c0_i32_160 : i32
    %477 = arith.index_cast %476 : i32 to index
    %c18 = arith.constant 18 : index
    %478 = memref.load %arg2[%477, %c18] : memref<15x32xf32, #tpu.memory_space<smem>>
    %c1_i32_161 = arith.constant 1 : i32
    %479 = arith.addi %37, %c1_i32_161 : i32
    %480 = arith.index_cast %479 : i32 to index
    %c18_162 = arith.constant 18 : index
    %481 = memref.load %arg2[%480, %c18_162] : memref<15x32xf32, #tpu.memory_space<smem>>
    %c2_i32_163 = arith.constant 2 : i32
    %482 = arith.addi %37, %c2_i32_163 : i32
    %483 = arith.index_cast %482 : i32 to index
    %c18_164 = arith.constant 18 : index
    %484 = memref.load %arg2[%483, %c18_164] : memref<15x32xf32, #tpu.memory_space<smem>>
    %c3_i32_165 = arith.constant 3 : i32
    %485 = arith.addi %37, %c3_i32_165 : i32
    %486 = arith.index_cast %485 : i32 to index
    %c18_166 = arith.constant 18 : index
    %487 = memref.load %arg2[%486, %c18_166] : memref<15x32xf32, #tpu.memory_space<smem>>
    %488 = vector.broadcast %478 : f32 to vector<8x8xf32>
    %489 = arith.mulf %33, %488 : vector<8x8xf32>
    %490 = vector.broadcast %481 : f32 to vector<8x8xf32>
    %491 = arith.mulf %36, %490 : vector<8x8xf32>
    %492 = arith.addf %489, %491 : vector<8x8xf32>
    %493 = vector.broadcast %484 : f32 to vector<8x8xf32>
    %494 = arith.addf %492, %493 : vector<8x8xf32>
    %cst_167 = arith.constant 0.000000e+00 : f32
    %495 = vector.broadcast %cst_167 : f32 to vector<8x8xf32>
    %496 = arith.maximumf %494, %495 : vector<8x8xf32>
    %497 = vector.broadcast %487 : f32 to vector<8x8xf32>
    %498 = arith.mulf %496, %497 : vector<8x8xf32>
    %499 = arith.addf %475, %498 : vector<8x8xf32>
    %c0_i32_168 = arith.constant 0 : i32
    %500 = arith.addi %37, %c0_i32_168 : i32
    %501 = arith.index_cast %500 : i32 to index
    %c19 = arith.constant 19 : index
    %502 = memref.load %arg2[%501, %c19] : memref<15x32xf32, #tpu.memory_space<smem>>
    %c1_i32_169 = arith.constant 1 : i32
    %503 = arith.addi %37, %c1_i32_169 : i32
    %504 = arith.index_cast %503 : i32 to index
    %c19_170 = arith.constant 19 : index
    %505 = memref.load %arg2[%504, %c19_170] : memref<15x32xf32, #tpu.memory_space<smem>>
    %c2_i32_171 = arith.constant 2 : i32
    %506 = arith.addi %37, %c2_i32_171 : i32
    %507 = arith.index_cast %506 : i32 to index
    %c19_172 = arith.constant 19 : index
    %508 = memref.load %arg2[%507, %c19_172] : memref<15x32xf32, #tpu.memory_space<smem>>
    %c3_i32_173 = arith.constant 3 : i32
    %509 = arith.addi %37, %c3_i32_173 : i32
    %510 = arith.index_cast %509 : i32 to index
    %c19_174 = arith.constant 19 : index
    %511 = memref.load %arg2[%510, %c19_174] : memref<15x32xf32, #tpu.memory_space<smem>>
    %512 = vector.broadcast %502 : f32 to vector<8x8xf32>
    %513 = arith.mulf %33, %512 : vector<8x8xf32>
    %514 = vector.broadcast %505 : f32 to vector<8x8xf32>
    %515 = arith.mulf %36, %514 : vector<8x8xf32>
    %516 = arith.addf %513, %515 : vector<8x8xf32>
    %517 = vector.broadcast %508 : f32 to vector<8x8xf32>
    %518 = arith.addf %516, %517 : vector<8x8xf32>
    %cst_175 = arith.constant 0.000000e+00 : f32
    %519 = vector.broadcast %cst_175 : f32 to vector<8x8xf32>
    %520 = arith.maximumf %518, %519 : vector<8x8xf32>
    %521 = vector.broadcast %511 : f32 to vector<8x8xf32>
    %522 = arith.mulf %520, %521 : vector<8x8xf32>
    %523 = arith.addf %499, %522 : vector<8x8xf32>
    %c0_i32_176 = arith.constant 0 : i32
    %524 = arith.addi %37, %c0_i32_176 : i32
    %525 = arith.index_cast %524 : i32 to index
    %c20 = arith.constant 20 : index
    %526 = memref.load %arg2[%525, %c20] : memref<15x32xf32, #tpu.memory_space<smem>>
    %c1_i32_177 = arith.constant 1 : i32
    %527 = arith.addi %37, %c1_i32_177 : i32
    %528 = arith.index_cast %527 : i32 to index
    %c20_178 = arith.constant 20 : index
    %529 = memref.load %arg2[%528, %c20_178] : memref<15x32xf32, #tpu.memory_space<smem>>
    %c2_i32_179 = arith.constant 2 : i32
    %530 = arith.addi %37, %c2_i32_179 : i32
    %531 = arith.index_cast %530 : i32 to index
    %c20_180 = arith.constant 20 : index
    %532 = memref.load %arg2[%531, %c20_180] : memref<15x32xf32, #tpu.memory_space<smem>>
    %c3_i32_181 = arith.constant 3 : i32
    %533 = arith.addi %37, %c3_i32_181 : i32
    %534 = arith.index_cast %533 : i32 to index
    %c20_182 = arith.constant 20 : index
    %535 = memref.load %arg2[%534, %c20_182] : memref<15x32xf32, #tpu.memory_space<smem>>
    %536 = vector.broadcast %526 : f32 to vector<8x8xf32>
    %537 = arith.mulf %33, %536 : vector<8x8xf32>
    %538 = vector.broadcast %529 : f32 to vector<8x8xf32>
    %539 = arith.mulf %36, %538 : vector<8x8xf32>
    %540 = arith.addf %537, %539 : vector<8x8xf32>
    %541 = vector.broadcast %532 : f32 to vector<8x8xf32>
    %542 = arith.addf %540, %541 : vector<8x8xf32>
    %cst_183 = arith.constant 0.000000e+00 : f32
    %543 = vector.broadcast %cst_183 : f32 to vector<8x8xf32>
    %544 = arith.maximumf %542, %543 : vector<8x8xf32>
    %545 = vector.broadcast %535 : f32 to vector<8x8xf32>
    %546 = arith.mulf %544, %545 : vector<8x8xf32>
    %547 = arith.addf %523, %546 : vector<8x8xf32>
    %c0_i32_184 = arith.constant 0 : i32
    %548 = arith.addi %37, %c0_i32_184 : i32
    %549 = arith.index_cast %548 : i32 to index
    %c21 = arith.constant 21 : index
    %550 = memref.load %arg2[%549, %c21] : memref<15x32xf32, #tpu.memory_space<smem>>
    %c1_i32_185 = arith.constant 1 : i32
    %551 = arith.addi %37, %c1_i32_185 : i32
    %552 = arith.index_cast %551 : i32 to index
    %c21_186 = arith.constant 21 : index
    %553 = memref.load %arg2[%552, %c21_186] : memref<15x32xf32, #tpu.memory_space<smem>>
    %c2_i32_187 = arith.constant 2 : i32
    %554 = arith.addi %37, %c2_i32_187 : i32
    %555 = arith.index_cast %554 : i32 to index
    %c21_188 = arith.constant 21 : index
    %556 = memref.load %arg2[%555, %c21_188] : memref<15x32xf32, #tpu.memory_space<smem>>
    %c3_i32_189 = arith.constant 3 : i32
    %557 = arith.addi %37, %c3_i32_189 : i32
    %558 = arith.index_cast %557 : i32 to index
    %c21_190 = arith.constant 21 : index
    %559 = memref.load %arg2[%558, %c21_190] : memref<15x32xf32, #tpu.memory_space<smem>>
    %560 = vector.broadcast %550 : f32 to vector<8x8xf32>
    %561 = arith.mulf %33, %560 : vector<8x8xf32>
    %562 = vector.broadcast %553 : f32 to vector<8x8xf32>
    %563 = arith.mulf %36, %562 : vector<8x8xf32>
    %564 = arith.addf %561, %563 : vector<8x8xf32>
    %565 = vector.broadcast %556 : f32 to vector<8x8xf32>
    %566 = arith.addf %564, %565 : vector<8x8xf32>
    %cst_191 = arith.constant 0.000000e+00 : f32
    %567 = vector.broadcast %cst_191 : f32 to vector<8x8xf32>
    %568 = arith.maximumf %566, %567 : vector<8x8xf32>
    %569 = vector.broadcast %559 : f32 to vector<8x8xf32>
    %570 = arith.mulf %568, %569 : vector<8x8xf32>
    %571 = arith.addf %547, %570 : vector<8x8xf32>
    %c0_i32_192 = arith.constant 0 : i32
    %572 = arith.addi %37, %c0_i32_192 : i32
    %573 = arith.index_cast %572 : i32 to index
    %c22 = arith.constant 22 : index
    %574 = memref.load %arg2[%573, %c22] : memref<15x32xf32, #tpu.memory_space<smem>>
    %c1_i32_193 = arith.constant 1 : i32
    %575 = arith.addi %37, %c1_i32_193 : i32
    %576 = arith.index_cast %575 : i32 to index
    %c22_194 = arith.constant 22 : index
    %577 = memref.load %arg2[%576, %c22_194] : memref<15x32xf32, #tpu.memory_space<smem>>
    %c2_i32_195 = arith.constant 2 : i32
    %578 = arith.addi %37, %c2_i32_195 : i32
    %579 = arith.index_cast %578 : i32 to index
    %c22_196 = arith.constant 22 : index
    %580 = memref.load %arg2[%579, %c22_196] : memref<15x32xf32, #tpu.memory_space<smem>>
    %c3_i32_197 = arith.constant 3 : i32
    %581 = arith.addi %37, %c3_i32_197 : i32
    %582 = arith.index_cast %581 : i32 to index
    %c22_198 = arith.constant 22 : index
    %583 = memref.load %arg2[%582, %c22_198] : memref<15x32xf32, #tpu.memory_space<smem>>
    %584 = vector.broadcast %574 : f32 to vector<8x8xf32>
    %585 = arith.mulf %33, %584 : vector<8x8xf32>
    %586 = vector.broadcast %577 : f32 to vector<8x8xf32>
    %587 = arith.mulf %36, %586 : vector<8x8xf32>
    %588 = arith.addf %585, %587 : vector<8x8xf32>
    %589 = vector.broadcast %580 : f32 to vector<8x8xf32>
    %590 = arith.addf %588, %589 : vector<8x8xf32>
    %cst_199 = arith.constant 0.000000e+00 : f32
    %591 = vector.broadcast %cst_199 : f32 to vector<8x8xf32>
    %592 = arith.maximumf %590, %591 : vector<8x8xf32>
    %593 = vector.broadcast %583 : f32 to vector<8x8xf32>
    %594 = arith.mulf %592, %593 : vector<8x8xf32>
    %595 = arith.addf %571, %594 : vector<8x8xf32>
    %c0_i32_200 = arith.constant 0 : i32
    %596 = arith.addi %37, %c0_i32_200 : i32
    %597 = arith.index_cast %596 : i32 to index
    %c23 = arith.constant 23 : index
    %598 = memref.load %arg2[%597, %c23] : memref<15x32xf32, #tpu.memory_space<smem>>
    %c1_i32_201 = arith.constant 1 : i32
    %599 = arith.addi %37, %c1_i32_201 : i32
    %600 = arith.index_cast %599 : i32 to index
    %c23_202 = arith.constant 23 : index
    %601 = memref.load %arg2[%600, %c23_202] : memref<15x32xf32, #tpu.memory_space<smem>>
    %c2_i32_203 = arith.constant 2 : i32
    %602 = arith.addi %37, %c2_i32_203 : i32
    %603 = arith.index_cast %602 : i32 to index
    %c23_204 = arith.constant 23 : index
    %604 = memref.load %arg2[%603, %c23_204] : memref<15x32xf32, #tpu.memory_space<smem>>
    %c3_i32_205 = arith.constant 3 : i32
    %605 = arith.addi %37, %c3_i32_205 : i32
    %606 = arith.index_cast %605 : i32 to index
    %c23_206 = arith.constant 23 : index
    %607 = memref.load %arg2[%606, %c23_206] : memref<15x32xf32, #tpu.memory_space<smem>>
    %608 = vector.broadcast %598 : f32 to vector<8x8xf32>
    %609 = arith.mulf %33, %608 : vector<8x8xf32>
    %610 = vector.broadcast %601 : f32 to vector<8x8xf32>
    %611 = arith.mulf %36, %610 : vector<8x8xf32>
    %612 = arith.addf %609, %611 : vector<8x8xf32>
    %613 = vector.broadcast %604 : f32 to vector<8x8xf32>
    %614 = arith.addf %612, %613 : vector<8x8xf32>
    %cst_207 = arith.constant 0.000000e+00 : f32
    %615 = vector.broadcast %cst_207 : f32 to vector<8x8xf32>
    %616 = arith.maximumf %614, %615 : vector<8x8xf32>
    %617 = vector.broadcast %607 : f32 to vector<8x8xf32>
    %618 = arith.mulf %616, %617 : vector<8x8xf32>
    %619 = arith.addf %595, %618 : vector<8x8xf32>
    %c0_i32_208 = arith.constant 0 : i32
    %620 = arith.addi %37, %c0_i32_208 : i32
    %621 = arith.index_cast %620 : i32 to index
    %c24 = arith.constant 24 : index
    %622 = memref.load %arg2[%621, %c24] : memref<15x32xf32, #tpu.memory_space<smem>>
    %c1_i32_209 = arith.constant 1 : i32
    %623 = arith.addi %37, %c1_i32_209 : i32
    %624 = arith.index_cast %623 : i32 to index
    %c24_210 = arith.constant 24 : index
    %625 = memref.load %arg2[%624, %c24_210] : memref<15x32xf32, #tpu.memory_space<smem>>
    %c2_i32_211 = arith.constant 2 : i32
    %626 = arith.addi %37, %c2_i32_211 : i32
    %627 = arith.index_cast %626 : i32 to index
    %c24_212 = arith.constant 24 : index
    %628 = memref.load %arg2[%627, %c24_212] : memref<15x32xf32, #tpu.memory_space<smem>>
    %c3_i32_213 = arith.constant 3 : i32
    %629 = arith.addi %37, %c3_i32_213 : i32
    %630 = arith.index_cast %629 : i32 to index
    %c24_214 = arith.constant 24 : index
    %631 = memref.load %arg2[%630, %c24_214] : memref<15x32xf32, #tpu.memory_space<smem>>
    %632 = vector.broadcast %622 : f32 to vector<8x8xf32>
    %633 = arith.mulf %33, %632 : vector<8x8xf32>
    %634 = vector.broadcast %625 : f32 to vector<8x8xf32>
    %635 = arith.mulf %36, %634 : vector<8x8xf32>
    %636 = arith.addf %633, %635 : vector<8x8xf32>
    %637 = vector.broadcast %628 : f32 to vector<8x8xf32>
    %638 = arith.addf %636, %637 : vector<8x8xf32>
    %cst_215 = arith.constant 0.000000e+00 : f32
    %639 = vector.broadcast %cst_215 : f32 to vector<8x8xf32>
    %640 = arith.maximumf %638, %639 : vector<8x8xf32>
    %641 = vector.broadcast %631 : f32 to vector<8x8xf32>
    %642 = arith.mulf %640, %641 : vector<8x8xf32>
    %643 = arith.addf %619, %642 : vector<8x8xf32>
    %c0_i32_216 = arith.constant 0 : i32
    %644 = arith.addi %37, %c0_i32_216 : i32
    %645 = arith.index_cast %644 : i32 to index
    %c25 = arith.constant 25 : index
    %646 = memref.load %arg2[%645, %c25] : memref<15x32xf32, #tpu.memory_space<smem>>
    %c1_i32_217 = arith.constant 1 : i32
    %647 = arith.addi %37, %c1_i32_217 : i32
    %648 = arith.index_cast %647 : i32 to index
    %c25_218 = arith.constant 25 : index
    %649 = memref.load %arg2[%648, %c25_218] : memref<15x32xf32, #tpu.memory_space<smem>>
    %c2_i32_219 = arith.constant 2 : i32
    %650 = arith.addi %37, %c2_i32_219 : i32
    %651 = arith.index_cast %650 : i32 to index
    %c25_220 = arith.constant 25 : index
    %652 = memref.load %arg2[%651, %c25_220] : memref<15x32xf32, #tpu.memory_space<smem>>
    %c3_i32_221 = arith.constant 3 : i32
    %653 = arith.addi %37, %c3_i32_221 : i32
    %654 = arith.index_cast %653 : i32 to index
    %c25_222 = arith.constant 25 : index
    %655 = memref.load %arg2[%654, %c25_222] : memref<15x32xf32, #tpu.memory_space<smem>>
    %656 = vector.broadcast %646 : f32 to vector<8x8xf32>
    %657 = arith.mulf %33, %656 : vector<8x8xf32>
    %658 = vector.broadcast %649 : f32 to vector<8x8xf32>
    %659 = arith.mulf %36, %658 : vector<8x8xf32>
    %660 = arith.addf %657, %659 : vector<8x8xf32>
    %661 = vector.broadcast %652 : f32 to vector<8x8xf32>
    %662 = arith.addf %660, %661 : vector<8x8xf32>
    %cst_223 = arith.constant 0.000000e+00 : f32
    %663 = vector.broadcast %cst_223 : f32 to vector<8x8xf32>
    %664 = arith.maximumf %662, %663 : vector<8x8xf32>
    %665 = vector.broadcast %655 : f32 to vector<8x8xf32>
    %666 = arith.mulf %664, %665 : vector<8x8xf32>
    %667 = arith.addf %643, %666 : vector<8x8xf32>
    %c0_i32_224 = arith.constant 0 : i32
    %668 = arith.addi %37, %c0_i32_224 : i32
    %669 = arith.index_cast %668 : i32 to index
    %c26 = arith.constant 26 : index
    %670 = memref.load %arg2[%669, %c26] : memref<15x32xf32, #tpu.memory_space<smem>>
    %c1_i32_225 = arith.constant 1 : i32
    %671 = arith.addi %37, %c1_i32_225 : i32
    %672 = arith.index_cast %671 : i32 to index
    %c26_226 = arith.constant 26 : index
    %673 = memref.load %arg2[%672, %c26_226] : memref<15x32xf32, #tpu.memory_space<smem>>
    %c2_i32_227 = arith.constant 2 : i32
    %674 = arith.addi %37, %c2_i32_227 : i32
    %675 = arith.index_cast %674 : i32 to index
    %c26_228 = arith.constant 26 : index
    %676 = memref.load %arg2[%675, %c26_228] : memref<15x32xf32, #tpu.memory_space<smem>>
    %c3_i32_229 = arith.constant 3 : i32
    %677 = arith.addi %37, %c3_i32_229 : i32
    %678 = arith.index_cast %677 : i32 to index
    %c26_230 = arith.constant 26 : index
    %679 = memref.load %arg2[%678, %c26_230] : memref<15x32xf32, #tpu.memory_space<smem>>
    %680 = vector.broadcast %670 : f32 to vector<8x8xf32>
    %681 = arith.mulf %33, %680 : vector<8x8xf32>
    %682 = vector.broadcast %673 : f32 to vector<8x8xf32>
    %683 = arith.mulf %36, %682 : vector<8x8xf32>
    %684 = arith.addf %681, %683 : vector<8x8xf32>
    %685 = vector.broadcast %676 : f32 to vector<8x8xf32>
    %686 = arith.addf %684, %685 : vector<8x8xf32>
    %cst_231 = arith.constant 0.000000e+00 : f32
    %687 = vector.broadcast %cst_231 : f32 to vector<8x8xf32>
    %688 = arith.maximumf %686, %687 : vector<8x8xf32>
    %689 = vector.broadcast %679 : f32 to vector<8x8xf32>
    %690 = arith.mulf %688, %689 : vector<8x8xf32>
    %691 = arith.addf %667, %690 : vector<8x8xf32>
    %c0_i32_232 = arith.constant 0 : i32
    %692 = arith.addi %37, %c0_i32_232 : i32
    %693 = arith.index_cast %692 : i32 to index
    %c27 = arith.constant 27 : index
    %694 = memref.load %arg2[%693, %c27] : memref<15x32xf32, #tpu.memory_space<smem>>
    %c1_i32_233 = arith.constant 1 : i32
    %695 = arith.addi %37, %c1_i32_233 : i32
    %696 = arith.index_cast %695 : i32 to index
    %c27_234 = arith.constant 27 : index
    %697 = memref.load %arg2[%696, %c27_234] : memref<15x32xf32, #tpu.memory_space<smem>>
    %c2_i32_235 = arith.constant 2 : i32
    %698 = arith.addi %37, %c2_i32_235 : i32
    %699 = arith.index_cast %698 : i32 to index
    %c27_236 = arith.constant 27 : index
    %700 = memref.load %arg2[%699, %c27_236] : memref<15x32xf32, #tpu.memory_space<smem>>
    %c3_i32_237 = arith.constant 3 : i32
    %701 = arith.addi %37, %c3_i32_237 : i32
    %702 = arith.index_cast %701 : i32 to index
    %c27_238 = arith.constant 27 : index
    %703 = memref.load %arg2[%702, %c27_238] : memref<15x32xf32, #tpu.memory_space<smem>>
    %704 = vector.broadcast %694 : f32 to vector<8x8xf32>
    %705 = arith.mulf %33, %704 : vector<8x8xf32>
    %706 = vector.broadcast %697 : f32 to vector<8x8xf32>
    %707 = arith.mulf %36, %706 : vector<8x8xf32>
    %708 = arith.addf %705, %707 : vector<8x8xf32>
    %709 = vector.broadcast %700 : f32 to vector<8x8xf32>
    %710 = arith.addf %708, %709 : vector<8x8xf32>
    %cst_239 = arith.constant 0.000000e+00 : f32
    %711 = vector.broadcast %cst_239 : f32 to vector<8x8xf32>
    %712 = arith.maximumf %710, %711 : vector<8x8xf32>
    %713 = vector.broadcast %703 : f32 to vector<8x8xf32>
    %714 = arith.mulf %712, %713 : vector<8x8xf32>
    %715 = arith.addf %691, %714 : vector<8x8xf32>
    %c0_i32_240 = arith.constant 0 : i32
    %716 = arith.addi %37, %c0_i32_240 : i32
    %717 = arith.index_cast %716 : i32 to index
    %c28 = arith.constant 28 : index
    %718 = memref.load %arg2[%717, %c28] : memref<15x32xf32, #tpu.memory_space<smem>>
    %c1_i32_241 = arith.constant 1 : i32
    %719 = arith.addi %37, %c1_i32_241 : i32
    %720 = arith.index_cast %719 : i32 to index
    %c28_242 = arith.constant 28 : index
    %721 = memref.load %arg2[%720, %c28_242] : memref<15x32xf32, #tpu.memory_space<smem>>
    %c2_i32_243 = arith.constant 2 : i32
    %722 = arith.addi %37, %c2_i32_243 : i32
    %723 = arith.index_cast %722 : i32 to index
    %c28_244 = arith.constant 28 : index
    %724 = memref.load %arg2[%723, %c28_244] : memref<15x32xf32, #tpu.memory_space<smem>>
    %c3_i32_245 = arith.constant 3 : i32
    %725 = arith.addi %37, %c3_i32_245 : i32
    %726 = arith.index_cast %725 : i32 to index
    %c28_246 = arith.constant 28 : index
    %727 = memref.load %arg2[%726, %c28_246] : memref<15x32xf32, #tpu.memory_space<smem>>
    %728 = vector.broadcast %718 : f32 to vector<8x8xf32>
    %729 = arith.mulf %33, %728 : vector<8x8xf32>
    %730 = vector.broadcast %721 : f32 to vector<8x8xf32>
    %731 = arith.mulf %36, %730 : vector<8x8xf32>
    %732 = arith.addf %729, %731 : vector<8x8xf32>
    %733 = vector.broadcast %724 : f32 to vector<8x8xf32>
    %734 = arith.addf %732, %733 : vector<8x8xf32>
    %cst_247 = arith.constant 0.000000e+00 : f32
    %735 = vector.broadcast %cst_247 : f32 to vector<8x8xf32>
    %736 = arith.maximumf %734, %735 : vector<8x8xf32>
    %737 = vector.broadcast %727 : f32 to vector<8x8xf32>
    %738 = arith.mulf %736, %737 : vector<8x8xf32>
    %739 = arith.addf %715, %738 : vector<8x8xf32>
    %c0_i32_248 = arith.constant 0 : i32
    %740 = arith.addi %37, %c0_i32_248 : i32
    %741 = arith.index_cast %740 : i32 to index
    %c29 = arith.constant 29 : index
    %742 = memref.load %arg2[%741, %c29] : memref<15x32xf32, #tpu.memory_space<smem>>
    %c1_i32_249 = arith.constant 1 : i32
    %743 = arith.addi %37, %c1_i32_249 : i32
    %744 = arith.index_cast %743 : i32 to index
    %c29_250 = arith.constant 29 : index
    %745 = memref.load %arg2[%744, %c29_250] : memref<15x32xf32, #tpu.memory_space<smem>>
    %c2_i32_251 = arith.constant 2 : i32
    %746 = arith.addi %37, %c2_i32_251 : i32
    %747 = arith.index_cast %746 : i32 to index
    %c29_252 = arith.constant 29 : index
    %748 = memref.load %arg2[%747, %c29_252] : memref<15x32xf32, #tpu.memory_space<smem>>
    %c3_i32_253 = arith.constant 3 : i32
    %749 = arith.addi %37, %c3_i32_253 : i32
    %750 = arith.index_cast %749 : i32 to index
    %c29_254 = arith.constant 29 : index
    %751 = memref.load %arg2[%750, %c29_254] : memref<15x32xf32, #tpu.memory_space<smem>>
    %752 = vector.broadcast %742 : f32 to vector<8x8xf32>
    %753 = arith.mulf %33, %752 : vector<8x8xf32>
    %754 = vector.broadcast %745 : f32 to vector<8x8xf32>
    %755 = arith.mulf %36, %754 : vector<8x8xf32>
    %756 = arith.addf %753, %755 : vector<8x8xf32>
    %757 = vector.broadcast %748 : f32 to vector<8x8xf32>
    %758 = arith.addf %756, %757 : vector<8x8xf32>
    %cst_255 = arith.constant 0.000000e+00 : f32
    %759 = vector.broadcast %cst_255 : f32 to vector<8x8xf32>
    %760 = arith.maximumf %758, %759 : vector<8x8xf32>
    %761 = vector.broadcast %751 : f32 to vector<8x8xf32>
    %762 = arith.mulf %760, %761 : vector<8x8xf32>
    %763 = arith.addf %739, %762 : vector<8x8xf32>
    %c0_i32_256 = arith.constant 0 : i32
    %764 = arith.addi %37, %c0_i32_256 : i32
    %765 = arith.index_cast %764 : i32 to index
    %c30 = arith.constant 30 : index
    %766 = memref.load %arg2[%765, %c30] : memref<15x32xf32, #tpu.memory_space<smem>>
    %c1_i32_257 = arith.constant 1 : i32
    %767 = arith.addi %37, %c1_i32_257 : i32
    %768 = arith.index_cast %767 : i32 to index
    %c30_258 = arith.constant 30 : index
    %769 = memref.load %arg2[%768, %c30_258] : memref<15x32xf32, #tpu.memory_space<smem>>
    %c2_i32_259 = arith.constant 2 : i32
    %770 = arith.addi %37, %c2_i32_259 : i32
    %771 = arith.index_cast %770 : i32 to index
    %c30_260 = arith.constant 30 : index
    %772 = memref.load %arg2[%771, %c30_260] : memref<15x32xf32, #tpu.memory_space<smem>>
    %c3_i32_261 = arith.constant 3 : i32
    %773 = arith.addi %37, %c3_i32_261 : i32
    %774 = arith.index_cast %773 : i32 to index
    %c30_262 = arith.constant 30 : index
    %775 = memref.load %arg2[%774, %c30_262] : memref<15x32xf32, #tpu.memory_space<smem>>
    %776 = vector.broadcast %766 : f32 to vector<8x8xf32>
    %777 = arith.mulf %33, %776 : vector<8x8xf32>
    %778 = vector.broadcast %769 : f32 to vector<8x8xf32>
    %779 = arith.mulf %36, %778 : vector<8x8xf32>
    %780 = arith.addf %777, %779 : vector<8x8xf32>
    %781 = vector.broadcast %772 : f32 to vector<8x8xf32>
    %782 = arith.addf %780, %781 : vector<8x8xf32>
    %cst_263 = arith.constant 0.000000e+00 : f32
    %783 = vector.broadcast %cst_263 : f32 to vector<8x8xf32>
    %784 = arith.maximumf %782, %783 : vector<8x8xf32>
    %785 = vector.broadcast %775 : f32 to vector<8x8xf32>
    %786 = arith.mulf %784, %785 : vector<8x8xf32>
    %787 = arith.addf %763, %786 : vector<8x8xf32>
    %c0_i32_264 = arith.constant 0 : i32
    %788 = arith.addi %37, %c0_i32_264 : i32
    %789 = arith.index_cast %788 : i32 to index
    %c31 = arith.constant 31 : index
    %790 = memref.load %arg2[%789, %c31] : memref<15x32xf32, #tpu.memory_space<smem>>
    %c1_i32_265 = arith.constant 1 : i32
    %791 = arith.addi %37, %c1_i32_265 : i32
    %792 = arith.index_cast %791 : i32 to index
    %c31_266 = arith.constant 31 : index
    %793 = memref.load %arg2[%792, %c31_266] : memref<15x32xf32, #tpu.memory_space<smem>>
    %c2_i32_267 = arith.constant 2 : i32
    %794 = arith.addi %37, %c2_i32_267 : i32
    %795 = arith.index_cast %794 : i32 to index
    %c31_268 = arith.constant 31 : index
    %796 = memref.load %arg2[%795, %c31_268] : memref<15x32xf32, #tpu.memory_space<smem>>
    %c3_i32_269 = arith.constant 3 : i32
    %797 = arith.addi %37, %c3_i32_269 : i32
    %798 = arith.index_cast %797 : i32 to index
    %c31_270 = arith.constant 31 : index
    %799 = memref.load %arg2[%798, %c31_270] : memref<15x32xf32, #tpu.memory_space<smem>>
    %800 = vector.broadcast %790 : f32 to vector<8x8xf32>
    %801 = arith.mulf %33, %800 : vector<8x8xf32>
    %802 = vector.broadcast %793 : f32 to vector<8x8xf32>
    %803 = arith.mulf %36, %802 : vector<8x8xf32>
    %804 = arith.addf %801, %803 : vector<8x8xf32>
    %805 = vector.broadcast %796 : f32 to vector<8x8xf32>
    %806 = arith.addf %804, %805 : vector<8x8xf32>
    %cst_271 = arith.constant 0.000000e+00 : f32
    %807 = vector.broadcast %cst_271 : f32 to vector<8x8xf32>
    %808 = arith.maximumf %806, %807 : vector<8x8xf32>
    %809 = vector.broadcast %799 : f32 to vector<8x8xf32>
    %810 = arith.mulf %808, %809 : vector<8x8xf32>
    %811 = arith.addf %787, %810 : vector<8x8xf32>
    %812 = arith.mulf %24, %811 : vector<8x8xf32>
    %cst_272 = arith.constant dense<0.000000e+00> : vector<8xf32>
    %813 = vector.multi_reduction <add>, %812, %cst_272 [1] : vector<8x8xf32> to vector<8xf32>
    %814 = vector.shape_cast %813 : vector<8xf32> to vector<8x1xf32>
    %cst_273 = arith.constant dense<0.000000e+00> : vector<8x2xf32>
    %815 = tpu.matmul %812, %13, %cst_273 {dimension_numbers = #tpu.dot_dimension_numbers<[1], [0], [0], [1], [0, 0, 1, 1], [], []>} : vector<8x8xf32>, vector<8x2xf32>, vector<8x2xf32> -> vector<8x2xf32>
    %816 = vector.broadcast %814 : vector<8x1xf32> to vector<8x2xf32>
    %817 = arith.mulf %10, %816 : vector<8x2xf32>
    %818 = arith.subf %817, %815 : vector<8x2xf32>
    %819 = arith.addf %10, %818 : vector<8x2xf32>
    %820 = arith.index_cast %4 : i32 to index
    %c0_274 = arith.constant 0 : index
    %821 = vector.load %arg15[%820, %c0_274] : memref<8x32xf32, #tpu.memory_space<vmem>>, vector<8x32xf32>
    tpu.vector_store %arg15[%820, %c0_274], %26 {strides = array<i32>} : memref<8x32xf32, #tpu.memory_space<vmem>>, vector<8x32xf32>,
    %822 = arith.index_cast %4 : i32 to index
    %c0_275 = arith.constant 0 : index
    %823 = vector.load %arg17[%822, %c0_275] : memref<8x2xf32, #tpu.memory_space<vmem>>, vector<8x2xf32>
    tpu.vector_store %arg17[%822, %c0_275], %819 {strides = array<i32>} : memref<8x2xf32, #tpu.memory_space<vmem>>, vector<8x2xf32>,
    %c2_i32_276 = arith.constant 2 : i32
    %824 = arith.cmpi eq, %arg0, %c2_i32_276 : i32
    %c0_i32_277 = arith.constant 0 : i32
    %825 = arith.cmpi eq, %arg1, %c0_i32_277 : i32
    %826 = arith.andi %824, %825 : i1
    %827 = arith.extui %826 : i1 to i32
    %c0_i32_278 = arith.constant 0 : i32
    %828 = arith.cmpi ne, %827, %c0_i32_278 : i32
    scf.if %828 {
      %c0_279 = arith.constant 0 : index
      %c0_280 = arith.constant 0 : index
      %829 = vector.load %arg9[%c0_279, %c0_280] : memref<2x8xf32, #tpu.memory_space<vmem>>, vector<2x8xf32>
      %c0_281 = arith.constant 0 : index
      %c0_282 = arith.constant 0 : index
      %830 = vector.load %arg15[%c0_281, %c0_282] : memref<8x32xf32, #tpu.memory_space<vmem>>, vector<8x32xf32>
      %cst_283 = arith.constant dense<0.000000e+00> : vector<2x32xf32>
      %831 = tpu.matmul %829, %830, %cst_283 {dimension_numbers = #tpu.dot_dimension_numbers<[1], [0], [0], [1], [0, 0, 1, 1], [], []>} : vector<2x8xf32>, vector<8x32xf32>, vector<2x32xf32> -> vector<2x32xf32>
      %c0_284 = arith.constant 0 : index
      %c0_285 = arith.constant 0 : index
      %832 = vector.load %arg10[%c0_284, %c0_285] : memref<32x32xf32, #tpu.memory_space<vmem>>, vector<32x32xf32>
      %cst_286 = arith.constant dense<0.000000e+00> : vector<2x32xf32>
      %833 = tpu.matmul %831, %832, %cst_286 {dimension_numbers = #tpu.dot_dimension_numbers<[1], [0], [0], [1], [0, 0, 1, 1], [], []>} : vector<2x32xf32>, vector<32x32xf32>, vector<2x32xf32> -> vector<2x32xf32>
      %c0_287 = arith.constant 0 : index
      %c0_288 = arith.constant 0 : index
      %834 = vector.load %arg11[%c0_287, %c0_288] : memref<1x32xf32, #tpu.memory_space<vmem>>, vector<1x32xf32>
      %835 = vector.broadcast %834 : vector<1x32xf32> to vector<2x32xf32>
      %836 = arith.addf %833, %835 : vector<2x32xf32>
      %cst_289 = arith.constant 0.000000e+00 : f32
      %837 = vector.broadcast %cst_289 : f32 to vector<2x32xf32>
      %838 = arith.maximumf %836, %837 : vector<2x32xf32>
      %c0_290 = arith.constant 0 : index
      %c0_291 = arith.constant 0 : index
      %839 = vector.load %arg12[%c0_290, %c0_291] : memref<32x3xf32, #tpu.memory_space<vmem>>, vector<32x3xf32>
      %cst_292 = arith.constant dense<0.000000e+00> : vector<2x3xf32>
      %840 = tpu.matmul %838, %839, %cst_292 {dimension_numbers = #tpu.dot_dimension_numbers<[1], [0], [0], [1], [0, 0, 1, 1], [], []>} : vector<2x32xf32>, vector<32x3xf32>, vector<2x3xf32> -> vector<2x3xf32>
      %c0_293 = arith.constant 0 : index
      %c0_294 = arith.constant 0 : index
      %841 = vector.load %arg13[%c0_293, %c0_294] : memref<1x3xf32, #tpu.memory_space<vmem>>, vector<1x3xf32>
      %842 = vector.broadcast %841 : vector<1x3xf32> to vector<2x3xf32>
      %843 = arith.addf %840, %842 : vector<2x3xf32>
      %c0_295 = arith.constant 0 : index
      %c0_296 = arith.constant 0 : index
      %844 = vector.load %arg14[%c0_295, %c0_296] : memref<2x3xf32, #tpu.memory_space<vmem>>, vector<2x3xf32>
      tpu.vector_store %arg14[%c0_295, %c0_296], %843 {strides = array<i32>} : memref<2x3xf32, #tpu.memory_space<vmem>>, vector<2x3xf32>,
    } else {
    }
    return
  }
  func.func @transform_0(%arg0: i32, %arg1: i32) -> (i32, i32) {
    %c0_i32 = arith.constant 0 : i32
    %c0_i32_0 = arith.constant 0 : i32
    %c0_i32_1 = arith.constant 0 : i32
    return %c0_i32, %c0_i32_0 : i32, i32
  }
  func.func @transform_1(%arg0: i32, %arg1: i32) -> (i32, i32) {
    %c0_i32 = arith.constant 0 : i32
    %c0_i32_0 = arith.constant 0 : i32
    %c0_i32_1 = arith.constant 0 : i32
    return %c0_i32, %c0_i32_0 : i32, i32
  }
  func.func @transform_2(%arg0: i32, %arg1: i32) -> (i32, i32) {
    %c0_i32 = arith.constant 0 : i32
    %c0_i32_0 = arith.constant 0 : i32
    %c0_i32_1 = arith.constant 0 : i32
    return %c0_i32, %c0_i32_0 : i32, i32
  }
  func.func @transform_3(%arg0: i32, %arg1: i32) -> (i32, i32) {
    %c0_i32 = arith.constant 0 : i32
    %c0_i32_0 = arith.constant 0 : i32
    %c0_i32_1 = arith.constant 0 : i32
    return %c0_i32, %c0_i32_0 : i32, i32
  }
  func.func @transform_4(%arg0: i32, %arg1: i32) -> (i32, i32) {
    %c0_i32 = arith.constant 0 : i32
    %c0_i32_0 = arith.constant 0 : i32
    %c0_i32_1 = arith.constant 0 : i32
    return %c0_i32, %c0_i32_0 : i32, i32
  }
  func.func @transform_5(%arg0: i32, %arg1: i32) -> (i32, i32, i32) {
    %c0_i32 = arith.constant 0 : i32
    %c0_i32_0 = arith.constant 0 : i32
    %c0_i32_1 = arith.constant 0 : i32
    return %arg0, %c0_i32, %c0_i32_0 : i32, i32, i32
  }
  func.func @transform_6(%arg0: i32, %arg1: i32) -> (i32, i32, i32) {
    %c0_i32 = arith.constant 0 : i32
    %c0_i32_0 = arith.constant 0 : i32
    %c0_i32_1 = arith.constant 0 : i32
    return %arg0, %c0_i32, %c0_i32_0 : i32, i32, i32
  }
  func.func @transform_7(%arg0: i32, %arg1: i32) -> (i32, i32) {
    %c0_i32 = arith.constant 0 : i32
    %c0_i32_0 = arith.constant 0 : i32
    %c0_i32_1 = arith.constant 0 : i32
    return %c0_i32, %c0_i32_0 : i32, i32
  }
  func.func @transform_8(%arg0: i32, %arg1: i32) -> (i32, i32) {
    %c0_i32 = arith.constant 0 : i32
    %c0_i32_0 = arith.constant 0 : i32
    %c0_i32_1 = arith.constant 0 : i32
    return %c0_i32, %c0_i32_0 : i32, i32
  }
  func.func @transform_9(%arg0: i32, %arg1: i32) -> (i32, i32) {
    %c0_i32 = arith.constant 0 : i32
    %c0_i32_0 = arith.constant 0 : i32
    %c0_i32_1 = arith.constant 0 : i32
    return %c0_i32, %c0_i32_0 : i32, i32
  }
  func.func @transform_10(%arg0: i32, %arg1: i32) -> (i32, i32) {
    %c0_i32 = arith.constant 0 : i32
    %c0_i32_0 = arith.constant 0 : i32
    %c0_i32_1 = arith.constant 0 : i32
    return %c0_i32, %c0_i32_0 : i32, i32
  }
  func.func @transform_11(%arg0: i32, %arg1: i32) -> (i32, i32) {
    %c0_i32 = arith.constant 0 : i32
    %c0_i32_0 = arith.constant 0 : i32
    %c0_i32_1 = arith.constant 0 : i32
    return %c0_i32, %c0_i32_0 : i32, i32
  }
  func.func @transform_12(%arg0: i32, %arg1: i32) -> (i32, i32) {
    %c0_i32 = arith.constant 0 : i32
    %c0_i32_0 = arith.constant 0 : i32
    %c0_i32_1 = arith.constant 0 : i32
    return %c0_i32, %c0_i32_0 : i32, i32
  }
}

</mosaic_0001>

<bundles_post_ra>
// kernel: equi_structure_regressor.1
= control target key start
LH: loop header
LB: loop body
LE: loop exit
PB: predicated region body
PF: predicated region fallthrough
CT: control target
= control target key end

     0   :  { %s3083_s0 = inlined_call_operand.vmem [shape: f32[15,32], index: 0, kind: input, shape index: {}]   ;;  %s3084_s1 = inlined_call_operand.vmem [shape: f32[8,10], index: 1, kind: input, shape index: {}]   ;;  %s3085_s2 = inlined_call_operand.vmem [shape: f32[10,32], index: 2, kind: input, shape index: {}]   ;;  %s3086_s3 = inlined_call_operand.vmem [shape: f32[1,32], index: 3, kind: input, shape index: {}]   ;;  %s3087_s4 = inlined_call_operand.vmem [shape: f32[8,2], index: 4, kind: input, shape index: {}]   ;;  %s3088_s5 = inlined_call_operand.vmem [shape: f32[3,32,96], index: 5, kind: input, shape index: {}]   ;;  %s3089_s6 = inlined_call_operand.vmem [shape: f32[3,1,96], index: 6, kind: input, shape index: {}]   ;;  %s3090_s7 = inlined_call_operand.vmem [shape: f32[2,8], index: 7, kind: input, shape index: {}]   ;;  %s3091_s8 = inlined_call_operand.vmem [shape: f32[32,32], index: 8, kind: input, shape index: {}]   ;;  %s3092_s9 = inlined_call_operand.vmem [shape: f32[1,32], index: 9, kind: input, shape index: {}]   ;;  %s3093_s10 = inlined_call_operand.vmem [shape: f32[32,3], index: 10, kind: input, shape index: {}]   ;;  %s3094_s11 = inlined_call_operand.vmem [shape: f32[1,3], index: 11, kind: input, shape index: {}]   ;;  %s3095_s12 = inlined_call_operand.hbm [shape: f32[2,3], index: 12, kind: output, shape index: {}]  }
   0x1   :  { %3098 = sst [smem:[#allocation18_spill]] %s3083_s0 }
   0x2   :  { %3099 = sst [smem:[#allocation19_spill]] %s3084_s1 }
   0x3   :  { %3100 = sst [smem:[#allocation20_spill]] %s3085_s2 }
   0x4   :  { %3101 = sst [smem:[#allocation21_spill]] %s3086_s3 }
   0x5   :  { %3102 = sst [smem:[#allocation22_spill]] %s3087_s4 }
   0x6   :  { %3103 = sst [smem:[#allocation23_spill]] %s3088_s5 }
   0x7   :  { %3104 = sst [smem:[#allocation24_spill]] %s3089_s6 }
   0x8   :  { %17 = vsyncpa [#allocation12], 0 }
   0x9   :  { %18 = vsyncpa [#allocation11], 0  ;;  %s2321_s21 = smov 0   ;;  %s2323_s22 = smov 0  }
   0xa   :  { %s2325_s23 = smov 0  }
   0xb LB: > { %3105 = sst [smem:[#allocation16_spill]] %s2236_s22  ;;  %s3096_s24 = sadd.s32 4294967295, %s2240_s23   ;;  %s2240_s23 = sphi %s2325_s23, %s24_s23   ;;  %s2236_s22 = sphi %s2323_s22, %s3121_s22   ;;  %s2232_s21 = sphi %s2321_s21, %s3120_s21  }
   0xc   : > { %s36_s25 = sadd.s32 1, %s2236_s22  ;;  %p1964_p1 = scmp.ge.s32.totalorder %s2240_s23, 1 }
   0xd   : > { %p38_p0 = scmp.ge.s32.totalorder %s36_s25, 3  ;;  %p324_p2 = scmp.lt.s32.totalorder %s2240_s23, 4 }
   0xe   : > { %p2348_p4 = scmp.eq.s32.totalorder %s3096_s24, 0  ;;  %s3109_s0 = sld [smem:[#allocation18_spill]] }
   0xf   : > { %s3123_s25 = smov (%p38_p0, %s36_s25), 0  ;;  %p2342_p3 = pnand %p1964_p1, %p324_p2 }
  0x10   : > { %3106 = sst [smem:[#allocation17_spill]] %s3123_s25 }
  0x11   : > { %p2117_p5 = pneg %p2342_p3 }
  0x13   : > { %p2359_p6 = pnand %p2348_p4, %p2117_p5 }
  0x14   : > { %s336_s30 = sshll.u32 %s3109_s0, 4  ;;  %s337_s30 = int_to_ptr.vmem [resolvable:$true] %s336_s30 }
  0x15   : > { %s2171_s14 = scalar_lea.vmem %s337_s30, 256  ;;  %p2173_p8 = pneg %p2359_p6 }
  0x16   : > { %p2172_p7 = scmp.ne.s32.totalorder %s337_s30, %s2171_s14  ;;  %p2179_p11 = scmp.lt.s32.totalorder %s337_s30, %s337_s30 }
  0x17   : > { %p2180_p12 = scmp.lt.s32.totalorder %s2171_s14, %s2171_s14 }
  0x18   : > { %p2174_p9 = pnand %p2173_p8, %p2172_p7 }
  0x19   : > { %p2181_p13 = por %p2180_p12, %p2179_p11 }
  0x1a   : > { %p2175_p10 = pneg %p2174_p9 }
  0x1c   : > { %p2182_p0 = pnand %p2181_p13, %p2175_p10 }
  0x1e   : > { %2185 = shalt.err (!%p2182_p0)
}
  0x1f   : > { %s2242_s15 = smov [#allocation10]   ;;  %s2243_s16 = smov 128  }
  0x20   : > { %s2244_s17 = smov 8   ;;  %393 = sbr.rel (%p2342_p3) target bundleno = 1898 (0x76a), region = 68 }
  0x21   : > { %2120 = dma.vmem_to_smem (!%p2359_p6), %s337_s30, 256, %s2242_s15, [#allocation12], %s2243_s16, %s2243_s16, %s2244_s17  }
  0x25   : > { %2223 = dma.done.wait (%p2348_p4), [#allocation12], 256  }
  0x26   : > { %2225 = vsyncadd (%p2348_p4), [#allocation12], 4294967040 }
  0x27   : > { %399 = sfence }
  0x28   : > { %p434_p1 = scmp.lt.s32.totalorder %s2232_s21, 2  ;;  %s3111_s6 = sld [smem:[#allocation24_spill]] }
  0x29   : > { %s3112_s5 = sld [smem:[#allocation23_spill]]  ;;  %p1971_p2 = scmp.ne.s32.totalorder %s2232_s21, 0 }
  0x2a   : > { %s2375_s18 = scalar_select %p434_p1, %s2232_s21, 2 }
  0x2b   : > { %449 = sbr.rel (%p1971_p2) target bundleno = 249 (0xf9), region = 80  ;;  %s3113_s2 = sld [smem:[#allocation20_spill]] (!%p1971_p2) }
  0x2c   : > { %s2002_s19 = sshll.u32 %s2375_s18, 5  ;;  %s3114_s1 = sld [smem:[#allocation19_spill]] (!%p1971_p2) }
  0x2d   : > { %s3115_s4 = sld [smem:[#allocation22_spill]] (!%p1971_p2) }
  0x2e   : > { %s441_s26 = scalar_lea.vmem %s3111_s6, %s2375_s18  ;;  %s3116_s3 = sld [smem:[#allocation21_spill]] (!%p1971_p2) }
  0x2f   : > { %s2385_s13 = scalar_lea.vmem %s3112_s5, %s2002_s19 }
  0x30   : > { %vm464_vm0 = vcmask 1041408   ;;  %v2245_v1 = vmov 0.0   ;;  %vm2246_vm1 = vmmov 0   ;;  %vm460_vm2 = vcmask 80896  }
  0x31   : > { %v452_v0 = vld [vmem:[%s3113_s2 + $0x8] sm:$0x3]  ;;  %2044 = vmatprep.subr.mxu0 %v2245_v1  ;;  %v451_v2 = vld [vmem:[%s3113_s2] sm:$0xff]  ;;  %2048 = vmatprep.mubr.msk.f32.mxu0 %vm2246_vm1, %v2245_v1  ;;  %vm541_vm3 = vcmask 15360   ;;  %vm538_vm4 = vcmask 261120  }
  0x32   : > { %2045 = vmatpush3.msk.msra.mxu0 %vm464_vm0, %v452_v0  ;;  %v450_v3 = vld [vmem:[%s3114_s1] sm:$0xff] }
  0x33   : > { %2046 = vmatprep.subr.mxu0 %v2245_v1  ;;  %v540_v4 = vld [vmem:[%s3115_s4] sm:$0xff] }
  0x34   : > { %2047 = vmatpush3.msra.mxu0 %v451_v2  ;;  %542 = vst.msk [vmem:[#allocation3] sm:$0xff] %vm541_vm3, %v540_v4  ;;  %v1972_v5 = vld [vmem:[%s3116_s3] ss:$0 sm:$0xff] }
  0x35   : > { %2049 = vmatmul.mubr.msk.f32.vlgmr.msra.gmra.mxu0 %vm460_vm2, %v450_v3 }
  0xf5   : > { %v534_v6 = vpop.f32.mrf.mxu0 }
  0xf6   : > { %v535_v7 = vadd.f32 %v1972_v5, %v534_v6 }
  0xf7   : > { %v2050_v8 = vpop.f32.mrf.mxu0 }
  0xf8   : > { %539 = vst.msk [vmem:[#allocation2] sm:$0xff] %vm538_vm4, %v535_v7 }
  0xf9 PF: > { %p1975_p3 = scmp.le.s32.totalorder %s2232_s21, 0 }
  0xfb   : > { %546 = sbr.rel (%p1975_p3) target bundleno = 258 (0x102), region = 84 }
 0x100   : > { %v547_v9 = vld [vmem:[#allocation4] sm:$0xff]  ;;  %vm548_vm5 = vcmask 15360  }
 0x101   : > { %549 = vst.msk [vmem:[#allocation3] sm:$0xff] %vm548_vm5, %v547_v9 }
 0x102 PF: > { %v554_v10 = vld [vmem:[%s2385_s13 + $0x18] sm:$0xff]  ;;  %v2247_v11 = vmov 0.0   ;;  %v553_v12 = vld [vmem:[%s2385_s13 + $0x10] sm:$0xff]  ;;  %vm2248_vm6 = vmmov 0   ;;  %v552_v13 = vld [vmem:[%s2385_s13 + $0x8] sm:$0xff]  ;;  %vm562_vm7 = vcmask 261120   ;;  %v646_v17 = vlaneseq }
 0x103   : > { %2051 = vmatprep.subr.mxu0 %v2247_v11  ;;  %2059 = vmatprep.mubr.msk.f32.mxu0 %vm2248_vm6, %v2247_v11  ;;  %v551_v14 = vld [vmem:[%s2385_s13] sm:$0xff]  ;;  %vm654_vm8 = vcmask 15360   ;;  %v2249_v25 = vmov 0   ;;  %v2250_v26 = vmov 1   ;;  %s2251_s14 = smov 96   ;;  %vm731_vm10 = vcmask 58368  }
 0x104   : > { %2052 = vmatpush3.msra.mxu0 %v554_v10  ;;  %2062 = vmatprep.subr.mxu1 %v2247_v11  ;;  %v550_v15 = vld [vmem:[#allocation2] sm:$0xff]  ;;  %v647_v18 = vshrl.u32 %v646_v17, 7  ;;  %v649_v19 = vand.u32 127, %v646_v17  ;;  %vm820_vm11 = vcmask 64512   ;;  %s2252_s18 = smov 64   ;;  %p1628_p4 = scmp.eq.s32.totalorder %s2232_s21, 2 }
 0x105   : > { %2053 = vmatprep.subr.mxu0 %v2247_v11  ;;  %2064 = vmatprep.mubr.msk.f32.mxu1 %vm2248_vm6, %v2247_v11  ;;  %v1976_v21 = vld [vmem:[%s441_s26] ss:$0 sm:$0xff]  ;;  %s2427_s26 = smul.u32 640, %s2232_s21  ;;  %vm2254_vm12 = vmmov (%p1628_p4), 0   ;;  %vm1877_vm13 = vcmask (%p1628_p4), 17408  }
 0x106   : > { %2054 = vmatpush3.msra.mxu0 %v553_v12  ;;  %vm650_vm9 = vcmp.eq.s32.totalorder %v647_v18, %v649_v19  ;;  %2163 = vset.pattern.permute.xlu1 %v2249_v25 }
 0x107   : > { %2055 = vmatprep.subr.mxu0 %v2247_v11  ;;  %v1978_v20 = vsel %vm650_vm9, 1.0, %v2247_v11  ;;  %2165 = vset.pattern.permute.xlu0 %v2250_v26  ;;  %s2430_s15 = sadd.s32 128, %s2427_s26  ;;  %s934_s16 = sld [smem:[#allocation10 + %s2427_s26]] }
 0x108   : > { %2056 = vmatpush3.msra.mxu0 %v552_v13  ;;  %v653_v16 = vld [vmem:[#allocation3] sm:$0xff]  ;;  %s937_s17 = sld [smem:[#allocation10 + %s2430_s15]]  ;;  %s955_s19 = sadd.s32 1, %s2427_s26 }
 0x109   : > { %2057 = vmatprep.subr.mxu0 %v2247_v11  ;;  %2063 = vmatpush3.xpose.msk.msra.mxu1 %vm654_vm8, %v653_v16  ;;  %s957_s20 = sadd.s32 1, %s2430_s15  ;;  %s2437_s28 = sld [smem:[#allocation10 + %s955_s19]] }
 0x10a   : > { %2058 = vmatpush3.msra.mxu0 %v551_v14  ;;  %2067 = vmatprep.subr.mxu1 %v2247_v11  ;;  %s2440_s29 = sadd.s32 256, %s2427_s26  ;;  %s2442_s30 = sld [smem:[#allocation10 + %s957_s20]] }
 0x10b   : > { %2060 = vmatmul.mubr.msk.f32.vlgmr.msra.gmra.mxu0 %vm562_vm7, %v550_v15  ;;  %2072 = vmatprep.subr.mxu0 %v2247_v11  ;;  %s974_s13 = sadd.s32 2, %s2427_s26  ;;  %s976_s27 = sadd.s32 2, %s2430_s15 }
 0x10c   : > { %2074 = vmatprep.mubr.msk.f32.mxu0 %vm2248_vm6, %v2247_v11  ;;  %2065 = vmatmul.mubr.msk.f32.vlgmr.msra.gmra.mxu1 %vm654_vm8, %v1978_v20  ;;  %s2454_s19 = sld [smem:[#allocation10 + %s974_s13]]  ;;  %s993_s24 = sadd.s32 3, %s2427_s26 }
 0x10d   : > { %2069 = vmatprep.mubr.msk.f32.mxu1 %vm2248_vm6, %v2247_v11  ;;  %910 = vperm.xlu1 %2163, %v653_v16   ;;  %v944_v46 = vstv %s934_s16  ;;  %s2456_s20 = sld [smem:[#allocation10 + %s976_s27]]  ;;  %s995_s0 = sadd.s32 3, %s2430_s15 }
 0x10e   : > { %v946_v47 = vstv %s937_s17  ;;  %s2463_s1 = sadd.s32 384, %s2427_s26  ;;  %s978_s17 = sadd.s32 2, %s2440_s29 }
 0x10f   : > { %v963_v52 = vstv %s2437_s28  ;;  %s2474_s13 = sld [smem:[#allocation10 + %s993_s24]]  ;;  %s1012_s2 = sadd.s32 4, %s2427_s26 }
 0x110   : > { %v965_v53 = vstv %s2442_s30  ;;  %s2476_s27 = sld [smem:[#allocation10 + %s995_s0]]  ;;  %s1014_s3 = sadd.s32 4, %s2430_s15 }
 0x111   : > { %2164 = vset.pattern.permute.xlu1 %v2250_v26  ;;  %s2004_s4 = sadd.s32 512, %s2427_s26  ;;  %s2486_s24 = sld [smem:[#allocation10 + %s978_s17]] }
 0x112   : > { %919 = vperm.xlu1 %2164, %v653_v16   ;;  %s961_s28 = sadd.s32 1, %s2463_s1  ;;  %s2490_s0 = sld [smem:[#allocation10 + %s1012_s2]]  ;;  %v982_v58 = vstv %s2454_s19 }
 0x113   : > { %v984_v59 = vstv %s2456_s20  ;;  %s997_s30 = sadd.s32 3, %s2440_s29  ;;  %s2495_s5 = sld [smem:[#allocation10 + %s1014_s3]] }
 0x114   : > { %s2497_s6 = sld [smem:[#allocation10 + %s2004_s4]]  ;;  %s1031_s25 = sadd.s32 5, %s2427_s26 }
 0x115   : > { %s2500_s22 = sld [smem:[#allocation10 + %s961_s28]]  ;;  %s980_s2 = sadd.s32 2, %s2463_s1  ;;  %v1001_v1 = vstv %s2474_s13 }
 0x116   : > { %s2507_s3 = sld [smem:[#allocation10 + %s997_s30]]  ;;  %v1003_v2 = vstv %s2476_s27  ;;  %s1016_s4 = sadd.s32 4, %s2440_s29 }
 0x117   : > { %s2512_s19 = sld [smem:[#allocation10 + %s1031_s25]]  ;;  %s1052_s28 = sadd.s32 6, %s2430_s15  ;;  %v987_v9 = vstv %s2486_s24 }
 0x118   : > { %s2517_s17 = sld [smem:[#allocation10 + %s980_s2]]  ;;  %s999_s13 = sadd.s32 3, %s2463_s1  ;;  %v1020_v10 = vstv %s2490_s0 }
 0x119   : > { %s2524_s25 = sld [smem:[#allocation10 + %s1016_s4]]  ;;  %s1035_s27 = sadd.s32 5, %s2440_s29 }
 0x11a   : > { %v931_v12 = vstv %s2497_s6  ;;  %s2536_s2 = sld [smem:[#allocation10 + %s999_s13]]  ;;  %s1071_s24 = sadd.s32 7, %s2430_s15 }
 0x11b   : > { %v971_v19 = vstv %s2500_s22  ;;  %s1018_s6 = sadd.s32 4, %s2463_s1  ;;  %s1054_s4 = sadd.s32 6, %s2440_s29 }
 0x11c   : > { %v1006_v20 = vstv %s2507_s3  ;;  %s2554_s22 = sld [smem:[#allocation10 + %s1018_s6]]  ;;  %s1090_s3 = sadd.s32 8, %s2430_s15 }
 0x11d   : > { %s1073_s13 = sadd.s32 7, %s2440_s29  ;;  %s1092_s6 = sadd.s32 8, %s2440_s29 }
 0x188   : > { %v911_v39 = vpop.permute.xlu1 %910 }
 0x18d   : > { %v920_v42 = vpop.permute.xlu1 %919 }
 0x1cb   : > { %v632_v22 = vpop.f32.mrf.mxu0 }
 0x1cc   : > { %v633_v23 = vadd.f32 %v1976_v21, %v632_v22  ;;  %v727_v27 = vpop.f32.mrf.mxu1  ;;  %v1039_v21 = vstv %s2512_s19  ;;  %s1037_s19 = sadd.s32 5, %s2463_s1 }
 0x1cd   : > { %v2061_v24 = vpop.f32.mrf.mxu0  ;;  %732 = vst.msk [vmem:[#allocation5] sm:$0x3] %vm731_vm10, %v727_v27 }
 0x1ce   : > { %636 = vst.msk [vmem:[#allocation6] sm:$0xff] %vm562_vm7, %v633_v23  ;;  %638 = vrot.lane.b32.xlu0 %v633_v23, %s2251_s14  ;;  %v2066_v28 = vpop.f32.mrf.mxu1  ;;  %s2451_s14 = sld [smem:[#allocation10 + %s2440_s29]] }
 0x1cf   : > { %v990_v28 = vstv %s2517_s17  ;;  %s1107_s17 = sadd.s32 9, %s2427_s26 }
 0x1d4   : > { %v1984_v40 = vld [vmem:[#allocation5] ss:$0 sm:$0xff]  ;;  %v1985_v41 = vld [vmem:[#allocation5 + $0x1] ss:$0 sm:$0xff]  ;;  %v949_v57 = vstv %s2451_s14  ;;  %s1033_s14 = sadd.s32 5, %s2430_s15 }
 0x1d5   : > { %v735_v31 = vld [vmem:[#allocation6] sm:$0xff]  ;;  %v2446_v44 = vsub.f32 %v911_v39, %v1984_v40  ;;  %v2448_v45 = vsub.f32 %v920_v42, %v1985_v41  ;;  %s2514_s20 = sld [smem:[#allocation10 + %s1033_s14]] }
 0x1d6   : > { %s2532_s14 = sld [smem:[#allocation10 + %s1052_s28]]  ;;  %s1088_s28 = sadd.s32 8, %s2427_s26 }
 0x1d7   : > { %v945_v49 = vmul.f32 %v944_v46, %v2446_v44  ;;  %v947_v50 = vmul.f32 %v946_v47, %v2448_v45  ;;  %v964_v55 = vmul.f32 %v963_v52, %v2446_v44  ;;  %v966_v56 = vmul.f32 %v965_v53, %v2448_v45 }
 0x1d8   : > { %v983_v63 = vmul.f32 %v982_v58, %v2446_v44  ;;  %v985_v0 = vmul.f32 %v984_v59, %v2448_v45  ;;  %v1002_v7 = vmul.f32 %v1001_v1, %v2446_v44  ;;  %v1004_v8 = vmul.f32 %v1003_v2, %v2448_v45 }
 0x1d9   : > { %v948_v54 = vadd.f32 %v947_v50, %v945_v49  ;;  %v967_v61 = vadd.f32 %v966_v56, %v964_v55  ;;  %v1021_v17 = vmul.f32 %v1020_v10, %v2446_v44  ;;  %v1028_v55 = vstv %s2554_s22 }
 0x1da   : > { %v986_v6 = vadd.f32 %v985_v0, %v983_v63 }
 0x1db   : > { %v950_v60 = vadd.f32 %v949_v57, %v948_v54  ;;  %v1041_v22 = vstv %s2514_s20  ;;  %s2562_s20 = sld [smem:[#allocation10 + %s1054_s4]] }
 0x1dc   : > { %v988_v15 = vadd.f32 %v987_v9, %v986_v6  ;;  %s2585_s4 = sld [smem:[#allocation10 + %s1107_s17]] }
 0x1dd   : > { %v951_v3 = vmax.f32 %v950_v60, 0.0 }
 0x1de   : > { %v989_v25 = vmax.f32 %v988_v15, 0.0 }
 0x1e1   : > { %v1063_v56 = vstv %s2562_s20  ;;  %s1147_s20 = sadd.s32 11, %s2430_s15 }
 0x240   : > { %v639_v29 = vpop.permute.xlu0 %638 }
 0x241   : > { %641 = vst.msk [vmem:[#allocation7] sm:$0xff] %vm562_vm7, %v639_v29  ;;  %v1025_v29 = vstv %s2524_s25  ;;  %s2572_s25 = sld [smem:[#allocation10 + %s1037_s19]] }
 0x247   : > { %v1047_v0 = vstv %s2572_s25  ;;  %s1164_s25 = sadd.s32 12, %s2427_s26 }
 0x248   : > { %v740_v30 = vld [vmem:[#allocation7] sm:$0xff] }
 0x249   : > { %2068 = vmatpush3.xpose.msk.msra.mxu1 %vm562_vm7, %v740_v30  ;;  %v1040_v30 = vmul.f32 %v1039_v21, %v2446_v44 }
 0x24a   : > { %2077 = vmatprep.subr.mxu1 %v2247_v11 }
 0x24c   : > { %2070 = vmatmul.mubr.msk.f32.vlgmr.msra.gmra.mxu1 %vm562_vm7, %v735_v31  ;;  %v1042_v31 = vmul.f32 %v1041_v22, %v2448_v45 }
 0x24d   : > { %2078 = vmatpush3.msra.mxu1 %v653_v16  ;;  %2079 = vmatprep.mubr.msk.f32.mxu1 %vm2248_vm6, %v2247_v11  ;;  %v1022_v11 = vstv %s2495_s5  ;;  %v1005_v16 = vadd.f32 %v1004_v8, %v1002_v7  ;;  %s2541_s5 = sld [smem:[#allocation10 + %s1035_s27]] }
 0x24e   : > { %v1023_v18 = vmul.f32 %v1022_v11, %v2448_v45  ;;  %s2567_s27 = sld [smem:[#allocation10 + %s1088_s28]]  ;;  %v1043_v39 = vadd.f32 %v1042_v31, %v1040_v30 }
 0x24f   : > { %v1007_v26 = vadd.f32 %v1006_v20, %v1005_v16 }
 0x250   : > { %v1024_v27 = vadd.f32 %v1023_v18, %v1021_v17 }
 0x253   : > { %v1044_v42 = vstv %s2541_s5  ;;  %s1128_s5 = sadd.s32 10, %s2430_s15 }
 0x254   : > { %v1096_v57 = vstv %s2567_s27  ;;  %s2605_s17 = sld [smem:[#allocation10 + %s1128_s5]]  ;;  %s1094_s27 = sadd.s32 8, %s2463_s1 }
 0x255   : > { %v1097_v2 = vmul.f32 %v1096_v57, %v2446_v44  ;;  %s1166_s5 = sadd.s32 12, %s2430_s15 }
 0x25a   : > { %v1136_v16 = vstv %s2605_s17  ;;  %s1132_s17 = sadd.s32 10, %s2463_s1 }
 0x30c   : > { %v816_v32 = vpop.f32.mrf.mxu1 }
 0x30d   : > { %v821_v33 = vsel %vm820_vm11, %v816_v32, -inf }
 0x30e   : > { %822 = vmax.xlane.f32.xlu0 %v821_v33  ;;  %v2071_v34 = vpop.f32.mrf.mxu1  ;;  %v1060_v33 = vstv %s2532_s14  ;;  %s2579_s14 = sld [smem:[#allocation10 + %s1073_s13]]  ;;  %s1111_s13 = sadd.s32 9, %s2440_s29 }
 0x30f   : > { %v1061_v41 = vmul.f32 %v1060_v33, %v2448_v45 }
 0x314   : > { %v1082_v1 = vstv %s2579_s14  ;;  %s2626_s14 = sld [smem:[#allocation10 + %s1094_s27]] }
 0x31a   : > { %v1104_v33 = vstv %s2626_s14  ;;  %s1221_s14 = sadd.s32 15, %s2427_s26 }
 0x324   : > { %642 = vrot.lane.b32.xlu0 %v633_v23, %s2252_s18  ;;  %s959_s18 = sadd.s32 1, %s2440_s29 }
 0x325   : > { %s2467_s16 = sld [smem:[#allocation10 + %s959_s18]] }
 0x326   : > { %s2480_s18 = sld [smem:[#allocation10 + %s2463_s1]] }
 0x32b   : > { %v968_v62 = vstv %s2467_s16  ;;  %s1050_s16 = sadd.s32 6, %s2427_s26 }
 0x32c   : > { %v969_v4 = vadd.f32 %v968_v62, %v967_v61  ;;  %v952_v5 = vstv %s2480_s18  ;;  %s2530_s30 = sld [smem:[#allocation10 + %s1050_s16]]  ;;  %s1069_s18 = sadd.s32 7, %s2427_s26 }
 0x32d   : > { %v953_v13 = vmul.f32 %v952_v5, %v951_v3  ;;  %s2546_s0 = sld [smem:[#allocation10 + %s1069_s18]] }
 0x32e   : > { %v970_v14 = vmax.f32 %v969_v4, 0.0  ;;  %s2551_s16 = sld [smem:[#allocation10 + %s1071_s24]]  ;;  %s1109_s24 = sadd.s32 9, %s2430_s15  ;;  %v1115_v4 = vstv %s2585_s4 }
 0x32f   : > { %v954_v23 = vadd.f32 %v953_v13, %v931_v12  ;;  %s2569_s18 = sld [smem:[#allocation10 + %s1090_s3]]  ;;  %s1113_s4 = sadd.s32 9, %s2463_s1  ;;  %v1116_v12 = vmul.f32 %v1115_v4, %v2446_v44 }
 0x330   : > { %v972_v24 = vmul.f32 %v971_v19, %v970_v14  ;;  %s2587_s28 = sld [smem:[#allocation10 + %s1109_s24]]  ;;  %s1145_s24 = sadd.s32 11, %s2427_s26 }
 0x332   : > { %v973_v34 = vadd.f32 %v972_v24, %v954_v23  ;;  %v1137_v23 = vmul.f32 %v1136_v16, %v2448_v45 }
 0x334   : > { %v1079_v46 = vstv %s2551_s16  ;;  %s1075_s16 = sadd.s32 7, %s2463_s1 }
 0x335   : > { %v1080_v54 = vmul.f32 %v1079_v46, %v2448_v45  ;;  %v1098_v58 = vstv %s2569_s18  ;;  %s2608_s22 = sld [smem:[#allocation10 + %s1075_s16]]  ;;  %s1149_s16 = sadd.s32 11, %s2440_s29 }
 0x336   : > { %v1099_v3 = vmul.f32 %v1098_v58, %v2448_v45  ;;  %s2616_s18 = sld [smem:[#allocation10 + %s1111_s13]]  ;;  %v1117_v5 = vstv %s2587_s28 }
 0x337   : > { %v1118_v13 = vmul.f32 %v1117_v5, %v2448_v45  ;;  %s2639_s13 = sld [smem:[#allocation10 + %s1164_s25]] }
 0x338   : > { %v1100_v11 = vadd.f32 %v1099_v3, %v1097_v2 }
 0x339   : > { %v1119_v21 = vadd.f32 %v1118_v13, %v1116_v12 }
 0x33b   : > { %v1085_v24 = vstv %s2608_s22  ;;  %s2662_s22 = sld [smem:[#allocation10 + %s1132_s17]]  ;;  %s1206_s17 = sadd.s32 14, %s2440_s29 }
 0x397   : > { %v823_v35 = vpop.xlane.xlu0 %822 }
 0x398   : > { %v824_v36 = vsub.f32 %v816_v32, %v823_v35  ;;  %v1058_v32 = vstv %s2530_s30  ;;  %v991_v35 = vmul.f32 %v990_v28, %v989_v25  ;;  %s1056_s30 = sadd.s32 6, %s2463_s1  ;;  %v1120_v25 = vstv %s2616_s18  ;;  %s1204_s18 = sadd.s32 14, %s2430_s15 }
 0x399   : > { %v1059_v40 = vmul.f32 %v1058_v32, %v2446_v44  ;;  %s2590_s3 = sld [smem:[#allocation10 + %s1056_s30]]  ;;  %s1130_s30 = sadd.s32 10, %s2440_s29  ;;  %v1121_v31 = vadd.f32 %v1120_v25, %v1119_v21 }
 0x39a   : > { %v825_v37 = vmul.f32 1.442695, %v824_v36  ;;  %v1008_v36 = vmax.f32 %v1007_v26, 0.0  ;;  %v992_v47 = vadd.f32 %v991_v35, %v973_v34  ;;  %s2633_s28 = sld [smem:[#allocation10 + %s1130_s30]]  ;;  %s1168_s30 = sadd.s32 12, %s2440_s29 }
 0x39b   : > { %v643_v38 = vpop.permute.xlu0 %642  ;;  %v1062_v52 = vadd.f32 %v1061_v41, %v1059_v40  ;;  %v1122_v41 = vmax.f32 %v1121_v31, 0.0 }
 0x39c   : > { %2166 = vpow2.f32 %v825_v37  ;;  %645 = vst.msk [vmem:[#allocation8] sm:$0xff] %vm562_vm7, %v643_v38  ;;  %v1026_v37 = vadd.f32 %v1025_v29, %v1024_v27  ;;  %v1009_v38 = vstv %s2536_s2  ;;  %s1126_s2 = sadd.s32 10, %s2427_s26 }
 0x39d   : > { %v1010_v49 = vmul.f32 %v1009_v38, %v1008_v36  ;;  %s2600_s19 = sld [smem:[#allocation10 + %s1126_s2]]  ;;  %v1064_v62 = vadd.f32 %v1063_v56, %v1062_v52 }
 0x39e   : > { %v1027_v50 = vmax.f32 %v1026_v37, 0.0  ;;  %s2623_s2 = sld [smem:[#allocation10 + %s1147_s20]]  ;;  %v1172_v37 = vstv %s2639_s13  ;;  %s1170_s13 = sadd.s32 12, %s2463_s1 }
 0x39f   : > { %v1011_v59 = vadd.f32 %v1010_v49, %v992_v47  ;;  %v1065_v8 = vmax.f32 %v1064_v62, 0.0  ;;  %v1066_v10 = vstv %s2590_s3  ;;  %s1183_s3 = sadd.s32 13, %s2427_s26  ;;  %s2644_s20 = sld [smem:[#allocation10 + %s1113_s4]]  ;;  %v1173_v47 = vmul.f32 %v1172_v37, %v2446_v44 }
 0x3a0   : > { %v1029_v60 = vmul.f32 %v1028_v55, %v1027_v50  ;;  %s2654_s27 = sld [smem:[#allocation10 + %s1183_s3]]  ;;  %v1139_v34 = vstv %s2633_s28  ;;  %s1187_s4 = sadd.s32 13, %s2440_s29 }
 0x3a1   : > { %v1067_v18 = vmul.f32 %v1066_v10, %v1065_v8  ;;  %s2677_s3 = sld [smem:[#allocation10 + %s1204_s18]] }
 0x3a2   : > { %v1030_v6 = vadd.f32 %v1029_v60, %v1011_v59  ;;  %s2698_s18 = sld [smem:[#allocation10 + %s1170_s13]]  ;;  %v1142_v60 = vstv %s2662_s22  ;;  %s1244_s13 = sadd.s32 16, %s2440_s29 }
 0x3a3   : > { %v741_v43 = vld [vmem:[#allocation8] sm:$0xff]  ;;  %v1134_v15 = vstv %s2600_s19  ;;  %s2649_s19 = sld [smem:[#allocation10 + %s1149_s16]] }
 0x3a4   : > { %2073 = vmatpush3.msra.mxu0 %v741_v43  ;;  %v1077_v43 = vstv %s2546_s0  ;;  %s2595_s0 = sld [smem:[#allocation10 + %s1092_s6]]  ;;  %v1135_v22 = vmul.f32 %v1134_v15, %v2446_v44  ;;  %v1155_v27 = vstv %s2623_s2 }
 0x3a5   : > { %v1078_v53 = vmul.f32 %v1077_v43, %v2446_v44  ;;  %s2621_s6 = sld [smem:[#allocation10 + %s1145_s24]]  ;;  %v1156_v36 = vmul.f32 %v1155_v27, %v2448_v45  ;;  %v1123_v43 = vstv %s2644_s20  ;;  %s1240_s20 = sadd.s32 16, %s2427_s26 }
 0x3a6   : > { %s2641_s24 = sld [smem:[#allocation10 + %s1166_s5]]  ;;  %s1202_s5 = sadd.s32 14, %s2427_s26  ;;  %v1138_v32 = vadd.f32 %v1137_v23, %v1135_v22 }
 0x3a7   : > { %v1081_v63 = vadd.f32 %v1080_v54, %v1078_v53  ;;  %s2670_s2 = sld [smem:[#allocation10 + %s1168_s30]]  ;;  %v1124_v54 = vmul.f32 %v1123_v43, %v1122_v41 }
 0x3a8   : > { %s2675_s16 = sld [smem:[#allocation10 + %s1202_s5]]  ;;  %v1180_v15 = vstv %s2698_s18  ;;  %s1297_s18 = sadd.s32 19, %s2427_s26 }
 0x3a9   : > { %v2460_v48 = vpop.eup %2166  ;;  %v1083_v9 = vadd.f32 %v1082_v1, %v1081_v63  ;;  %v1158_v50 = vstv %s2649_s19  ;;  %s2693_s30 = sld [smem:[#allocation10 + %s1221_s14]]  ;;  %s1242_s19 = sadd.s32 16, %s2430_s15  ;;  %v1212_v63 = vstv %s2677_s3 }
 0x3aa   : > { %v827_v51 = vsel %vm820_vm11, %v2460_v48, 0.0  ;;  %v1101_v14 = vstv %s2595_s0  ;;  %s1185_s0 = sadd.s32 13, %s2430_s15  ;;  %s2713_s14 = sld [smem:[#allocation10 + %s1242_s19]]  ;;  %v1213_v8 = vmul.f32 %v1212_v63, %v2448_v45 }
 0x3ab   : > { %828 = vadd.xlane.f32.xlu1 %v827_v51  ;;  %v1045_v51 = vadd.f32 %v1044_v42, %v1043_v39  ;;  %v1084_v19 = vmax.f32 %v1083_v9, 0.0  ;;  %v1102_v20 = vadd.f32 %v1101_v14, %v1100_v11  ;;  %v1153_v26 = vstv %s2621_s6  ;;  %s2659_s25 = sld [smem:[#allocation10 + %s1185_s0]]  ;;  %s1151_s6 = sadd.s32 11, %s2463_s1 }
 0x3ac   : > { %v1154_v35 = vmul.f32 %v1153_v26, %v2446_v44  ;;  %v1174_v38 = vstv %s2641_s24  ;;  %v1140_v42 = vadd.f32 %v1139_v34, %v1138_v32  ;;  %s2680_s28 = sld [smem:[#allocation10 + %s1151_s6]]  ;;  %s1223_s0 = sadd.s32 15, %s2430_s15 }
 0x3ad   : > { %v1046_v61 = vmax.f32 %v1045_v51, 0.0  ;;  %v1086_v29 = vmul.f32 %v1085_v24, %v1084_v19  ;;  %v1103_v30 = vmax.f32 %v1102_v20, 0.0  ;;  %v1175_v49 = vmul.f32 %v1174_v38, %v2448_v45  ;;  %s2687_s24 = sld [smem:[#allocation10 + %s1187_s4]]  ;;  %s1225_s4 = sadd.s32 15, %s2440_s29 }
 0x3ae   : > { %v1157_v46 = vadd.f32 %v1156_v36, %v1154_v35  ;;  %v1191_v51 = vstv %s2654_s27  ;;  %s2695_s5 = sld [smem:[#allocation10 + %s1223_s0]]  ;;  %v1141_v55 = vmax.f32 %v1140_v42, 0.0  ;;  %v1210_v62 = vstv %s2675_s16  ;;  %s1259_s0 = sadd.s32 17, %s2427_s26 }
 0x3af   : > { %v1048_v7 = vmul.f32 %v1047_v0, %v1046_v61  ;;  %v1105_v40 = vmul.f32 %v1104_v33, %v1103_v30  ;;  %v1176_v57 = vadd.f32 %v1175_v49, %v1173_v47  ;;  %v1192_v58 = vmul.f32 %v1191_v51, %v2446_v44  ;;  %s2703_s27 = sld [smem:[#allocation10 + %s1206_s17]]  ;;  %s1208_s16 = sadd.s32 14, %s2463_s1 }
 0x3b0   : > { %v1159_v56 = vadd.f32 %v1158_v50, %v1157_v46  ;;  %v1177_v61 = vstv %s2670_s2  ;;  %s2708_s6 = sld [smem:[#allocation10 + %s1240_s20]]  ;;  %v1143_v1 = vmul.f32 %v1142_v60, %v1141_v55  ;;  %s1261_s2 = sadd.s32 17, %s2430_s15  ;;  %v1229_v9 = vstv %s2693_s30 }
 0x3b1   : > { %v1049_v17 = vadd.f32 %v1048_v7, %v1030_v6  ;;  %v1193_v52 = vstv %s2659_s25  ;;  %s1189_s25 = sadd.s32 13, %s2463_s1  ;;  %v1178_v3 = vadd.f32 %v1177_v61, %v1176_v57  ;;  %v1211_v7 = vmul.f32 %v1210_v62, %v2446_v44  ;;  %s2724_s3 = sld [smem:[#allocation10 + %s1225_s4]] }
 0x3b2   : > { %v1194_v59 = vmul.f32 %v1193_v52, %v2448_v45  ;;  %v1160_v2 = vmax.f32 %v1159_v56, 0.0  ;;  %s2716_s22 = sld [smem:[#allocation10 + %s1189_s25]]  ;;  %v1161_v5 = vstv %s2680_s28  ;;  %s1278_s28 = sadd.s32 18, %s2427_s26  ;;  %v1250_v21 = vstv %s2713_s14 }
 0x3b3   : > { %v1068_v28 = vadd.f32 %v1067_v18, %v1049_v17  ;;  %v1196_v6 = vstv %s2687_s24  ;;  %s2729_s17 = sld [smem:[#allocation10 + %s1259_s0]]  ;;  %v1179_v13 = vmax.f32 %v1178_v3, 0.0  ;;  %s1280_s19 = sadd.s32 18, %s2430_s15  ;;  %v1214_v16 = vadd.f32 %v1213_v8, %v1211_v7 }
 0x3b4   : > { %v1195_v4 = vadd.f32 %v1194_v59, %v1192_v58  ;;  %v1231_v10 = vstv %s2695_s5  ;;  %s2731_s20 = sld [smem:[#allocation10 + %s1261_s2]]  ;;  %v1162_v12 = vmul.f32 %v1161_v5, %v1160_v2  ;;  %s1227_s30 = sadd.s32 15, %s2463_s1  ;;  %v1230_v17 = vmul.f32 %v1229_v9, %v2446_v44 }
 0x3b5   : > { %v1087_v39 = vadd.f32 %v1086_v29, %v1068_v28  ;;  %s2734_s24 = sld [smem:[#allocation10 + %s1208_s16]]  ;;  %v1232_v18 = vmul.f32 %v1231_v10, %v2448_v45  ;;  %v1215_v19 = vstv %s2703_s27  ;;  %s1263_s25 = sadd.s32 17, %s2440_s29  ;;  %v1181_v23 = vmul.f32 %v1180_v15, %v1179_v13 }
 0x3b6   : > { %v1197_v14 = vadd.f32 %v1196_v6, %v1195_v4  ;;  %s2741_s5 = sld [smem:[#allocation10 + %s1244_s13]]  ;;  %v1248_v20 = vstv %s2708_s6  ;;  %s1299_s27 = sadd.s32 19, %s2430_s15  ;;  %v1216_v25 = vadd.f32 %v1215_v19, %v1214_v16  ;;  %v1251_v28 = vmul.f32 %v1250_v21, %v2448_v45 }
 0x3b7   : > { %v1106_v53 = vadd.f32 %v1105_v40, %v1087_v39  ;;  %s2747_s4 = sld [smem:[#allocation10 + %s1278_s28]]  ;;  %v1233_v26 = vadd.f32 %v1232_v18, %v1230_v17  ;;  %v1249_v27 = vmul.f32 %v1248_v20, %v2446_v44  ;;  %v1234_v30 = vstv %s2724_s3  ;;  %s1246_s14 = sadd.s32 16, %s2463_s1 }
 0x3b8   : > { %s2749_s0 = sld [smem:[#allocation10 + %s1280_s19]]  ;;  %v1198_v24 = vmax.f32 %v1197_v14, 0.0  ;;  %v1199_v29 = vstv %s2716_s22  ;;  %s1282_s13 = sadd.s32 18, %s2440_s29  ;;  %v1217_v35 = vmax.f32 %v1216_v25, 0.0 }
 0x3b9   : > { %v1125_v0 = vadd.f32 %v1124_v54, %v1106_v53  ;;  %s2752_s2 = sld [smem:[#allocation10 + %s1227_s30]]  ;;  %v1267_v31 = vstv %s2729_s17  ;;  %s1316_s19 = sadd.s32 20, %s2427_s26  ;;  %v1235_v36 = vadd.f32 %v1234_v30, %v1233_v26  ;;  %v1252_v37 = vadd.f32 %v1251_v28, %v1249_v27 }
 0x3ba   : > { %s2757_s6 = sld [smem:[#allocation10 + %s1263_s25]]  ;;  %v1269_v32 = vstv %s2731_s20  ;;  %v1200_v34 = vmul.f32 %v1199_v29, %v1198_v24  ;;  %s1318_s3 = sadd.s32 20, %s2430_s15  ;;  %v1268_v40 = vmul.f32 %v1267_v31, %v2446_v44 }
 0x3bb   : > { %v1144_v11 = vadd.f32 %v1143_v1, %v1125_v0  ;;  %s2762_s16 = sld [smem:[#allocation10 + %s1297_s18]]  ;;  %v1218_v38 = vstv %s2734_s24  ;;  %s1265_s17 = sadd.s32 17, %s2463_s1  ;;  %v1270_v41 = vmul.f32 %v1269_v32, %v2448_v45  ;;  %v1236_v49 = vmax.f32 %v1235_v36, 0.0 }
 0x3bc   : > { %s2767_s28 = sld [smem:[#allocation10 + %s1299_s27]]  ;;  %v1253_v39 = vstv %s2741_s5  ;;  %s1301_s30 = sadd.s32 19, %s2440_s29  ;;  %v1219_v47 = vmul.f32 %v1218_v38, %v1217_v35 }
 0x3bd   : > { %v1163_v22 = vadd.f32 %v1162_v12, %v1144_v11  ;;  %s2770_s22 = sld [smem:[#allocation10 + %s1246_s14]]  ;;  %v1286_v42 = vstv %s2747_s4  ;;  %s1335_s24 = sadd.s32 21, %s2427_s26  ;;  %v1254_v50 = vadd.f32 %v1253_v39, %v1252_v37  ;;  %v1271_v52 = vadd.f32 %v1270_v41, %v1268_v40 }
 0x3be   : > { %s2778_s20 = sld [smem:[#allocation10 + %s1282_s13]]  ;;  %v1288_v43 = vstv %s2749_s0  ;;  %s1337_s27 = sadd.s32 21, %s2430_s15  ;;  %v1287_v53 = vmul.f32 %v1286_v42, %v2446_v44 }
 0x3bf   : > { %v1182_v33 = vadd.f32 %v1181_v23, %v1163_v22  ;;  %s2783_s25 = sld [smem:[#allocation10 + %s1316_s19]]  ;;  %v1237_v51 = vstv %s2752_s2  ;;  %s1284_s4 = sadd.s32 18, %s2463_s1  ;;  %v1289_v54 = vmul.f32 %v1288_v43, %v2448_v45  ;;  %v1255_v60 = vmax.f32 %v1254_v50, 0.0 }
 0x3c0   : > { %s2785_s18 = sld [smem:[#allocation10 + %s1318_s3]]  ;;  %v1272_v55 = vstv %s2757_s6  ;;  %s1320_s14 = sadd.s32 20, %s2440_s29  ;;  %v1238_v59 = vmul.f32 %v1237_v51, %v1236_v49 }
 0x3c1   : > { %v1201_v46 = vadd.f32 %v1200_v34, %v1182_v33  ;;  %s2788_s5 = sld [smem:[#allocation10 + %s1265_s17]]  ;;  %v1305_v56 = vstv %s2762_s16  ;;  %s1354_s2 = sadd.s32 22, %s2427_s26  ;;  %v1273_v61 = vadd.f32 %v1272_v55, %v1271_v52  ;;  %v1290_v62 = vadd.f32 %v1289_v54, %v1287_v53 }
 0x3c2   : > { %s2795_s0 = sld [smem:[#allocation10 + %s1301_s30]]  ;;  %v1307_v57 = vstv %s2767_s28  ;;  %s1356_s6 = sadd.s32 22, %s2430_s15  ;;  %v1306_v63 = vmul.f32 %v1305_v56, %v2446_v44 }
 0x3c3   : > { %s2801_s13 = sld [smem:[#allocation10 + %s1335_s24]]  ;;  %v1220_v58 = vadd.f32 %v1219_v47, %v1201_v46  ;;  %v1308_v0 = vmul.f32 %v1307_v57, %v2448_v45  ;;  %v1256_v1 = vstv %s2770_s22  ;;  %s1303_s28 = sadd.s32 19, %s2463_s1  ;;  %v1274_v7 = vmax.f32 %v1273_v61, 0.0 }
 0x3c4   : > { %s2803_s19 = sld [smem:[#allocation10 + %s1337_s27]]  ;;  %v1291_v2 = vstv %s2778_s20  ;;  %s1339_s30 = sadd.s32 21, %s2440_s29  ;;  %v1257_v6 = vmul.f32 %v1256_v1, %v1255_v60 }
 0x3c5   : > { %s2806_s3 = sld [smem:[#allocation10 + %s1284_s4]]  ;;  %v1324_v3 = vstv %s2783_s25  ;;  %v1239_v5 = vadd.f32 %v1238_v59, %v1220_v58  ;;  %s1373_s27 = sadd.s32 23, %s2427_s26  ;;  %v1292_v8 = vadd.f32 %v1291_v2, %v1290_v62  ;;  %v1309_v9 = vadd.f32 %v1308_v0, %v1306_v63 }
 0x3c6   : > { %s2811_s16 = sld [smem:[#allocation10 + %s1320_s14]]  ;;  %v1326_v4 = vstv %s2785_s18  ;;  %s1375_s20 = sadd.s32 23, %s2430_s15  ;;  %v1325_v12 = vmul.f32 %v1324_v3, %v2446_v44 }
 0x3c7   : > { %s2816_s17 = sld [smem:[#allocation10 + %s1354_s2]]  ;;  %v1275_v10 = vstv %s2788_s5  ;;  %s1322_s25 = sadd.s32 20, %s2463_s1  ;;  %v1327_v13 = vmul.f32 %v1326_v4, %v2448_v45  ;;  %v1258_v16 = vadd.f32 %v1257_v6, %v1239_v5  ;;  %v1293_v18 = vmax.f32 %v1292_v8, 0.0 }
 0x3c8   : > { %s2821_s24 = sld [smem:[#allocation10 + %s1356_s6]]  ;;  %v1310_v11 = vstv %s2795_s0  ;;  %s1358_s4 = sadd.s32 22, %s2440_s29  ;;  %v1276_v17 = vmul.f32 %v1275_v10, %v1274_v7 }
 0x3c9   : > { %s2824_s22 = sld [smem:[#allocation10 + %s1303_s28]]  ;;  %v1343_v14 = vstv %s2801_s13  ;;  %s1392_s5 = sadd.s32 24, %s2427_s26  ;;  %v1311_v19 = vadd.f32 %v1310_v11, %v1309_v9  ;;  %v1328_v21 = vadd.f32 %v1327_v13, %v1325_v12 }
 0x3ca   : > { %s2832_s18 = sld [smem:[#allocation10 + %s1339_s30]]  ;;  %v1345_v15 = vstv %s2803_s19  ;;  %s1394_s6 = sadd.s32 24, %s2430_s15  ;;  %v1344_v22 = vmul.f32 %v1343_v14, %v2446_v44  ;;  %v1277_v27 = vadd.f32 %v1276_v17, %v1258_v16 }
 0x3cb   : > { %s2837_s14 = sld [smem:[#allocation10 + %s1373_s27]]  ;;  %v1294_v20 = vstv %s2806_s3  ;;  %s1341_s13 = sadd.s32 21, %s2463_s1  ;;  %v1346_v23 = vmul.f32 %v1345_v15, %v2448_v45  ;;  %v1312_v29 = vmax.f32 %v1311_v19, 0.0 }
 0x3cc   : > { %s2839_s2 = sld [smem:[#allocation10 + %s1375_s20]]  ;;  %v1329_v24 = vstv %s2811_s16  ;;  %s1377_s28 = sadd.s32 23, %s2440_s29  ;;  %v1295_v28 = vmul.f32 %v1294_v20, %v1293_v18 }
 0x3cd   : > { %s2842_s0 = sld [smem:[#allocation10 + %s1322_s25]]  ;;  %v1362_v25 = vstv %s2816_s17  ;;  %s1411_s3 = sadd.s32 25, %s2427_s26  ;;  %v1330_v30 = vadd.f32 %v1329_v24, %v1328_v21  ;;  %v1347_v31 = vadd.f32 %v1346_v23, %v1344_v22 }
 0x3ce   : > { %s2849_s19 = sld [smem:[#allocation10 + %s1358_s4]]  ;;  %v1364_v26 = vstv %s2821_s24  ;;  %s1413_s16 = sadd.s32 25, %s2430_s15  ;;  %v1363_v32 = vmul.f32 %v1362_v25, %v2446_v44  ;;  %v1296_v38 = vadd.f32 %v1295_v28, %v1277_v27 }
 0x3cf   : > { %s2855_s30 = sld [smem:[#allocation10 + %s1392_s5]]  ;;  %v1365_v33 = vmul.f32 %v1364_v26, %v2448_v45  ;;  %v1313_v34 = vstv %s2824_s22  ;;  %s1360_s24 = sadd.s32 22, %s2463_s1  ;;  %v1331_v40 = vmax.f32 %v1330_v30, 0.0 }
 0x3d0   : > { %s2857_s27 = sld [smem:[#allocation10 + %s1394_s6]]  ;;  %v1348_v35 = vstv %s2832_s18  ;;  %s1396_s4 = sadd.s32 24, %s2440_s29  ;;  %v1314_v39 = vmul.f32 %v1313_v34, %v1312_v29 }
 0x3d1   : > { %s2860_s20 = sld [smem:[#allocation10 + %s1341_s13]]  ;;  %v1381_v36 = vstv %s2837_s14  ;;  %s1430_s6 = sadd.s32 26, %s2427_s26  ;;  %v1349_v41 = vadd.f32 %v1348_v35, %v1347_v31  ;;  %v1366_v42 = vadd.f32 %v1365_v33, %v1363_v32 }
 0x3d2   : > { %s2865_s17 = sld [smem:[#allocation10 + %s1377_s28]]  ;;  %v1383_v37 = vstv %s2839_s2  ;;  %s1432_s18 = sadd.s32 26, %s2430_s15  ;;  %v1382_v47 = vmul.f32 %v1381_v36, %v2446_v44  ;;  %v1315_v52 = vadd.f32 %v1314_v39, %v1296_v38 }
 0x3d3   : > { %s2870_s25 = sld [smem:[#allocation10 + %s1411_s3]]  ;;  %v1332_v43 = vstv %s2842_s0  ;;  %s1379_s14 = sadd.s32 23, %s2463_s1  ;;  %v1384_v49 = vmul.f32 %v1383_v37, %v2448_v45  ;;  %v1350_v54 = vmax.f32 %v1349_v41, 0.0 }
 0x3d4   : > { %s2875_s5 = sld [smem:[#allocation10 + %s1413_s16]]  ;;  %v1367_v46 = vstv %s2849_s19  ;;  %s1415_s13 = sadd.s32 25, %s2440_s29  ;;  %v1333_v53 = vmul.f32 %v1332_v43, %v1331_v40 }
 0x3d5   : > { %s2878_s22 = sld [smem:[#allocation10 + %s1360_s24]]  ;;  %v1400_v50 = vstv %s2855_s30  ;;  %s1449_s0 = sadd.s32 27, %s2427_s26  ;;  %v1368_v55 = vadd.f32 %v1367_v46, %v1366_v42  ;;  %v1385_v57 = vadd.f32 %v1384_v49, %v1382_v47 }
 0x3d6   : > { %s2886_s2 = sld [smem:[#allocation10 + %s1396_s4]]  ;;  %v1402_v51 = vstv %s2857_s27  ;;  %s1451_s16 = sadd.s32 27, %s2430_s15  ;;  %v1401_v58 = vmul.f32 %v1400_v50, %v2446_v44  ;;  %v1334_v63 = vadd.f32 %v1333_v53, %v1315_v52 }
 0x3d7   : > { %s2891_s28 = sld [smem:[#allocation10 + %s1430_s6]]  ;;  %v1351_v56 = vstv %s2860_s20  ;;  %s1398_s30 = sadd.s32 24, %s2463_s1  ;;  %v1403_v59 = vmul.f32 %v1402_v51, %v2448_v45  ;;  %v1369_v1 = vmax.f32 %v1368_v55, 0.0 }
 0x3d8   : > { %s2893_s3 = sld [smem:[#allocation10 + %s1432_s18]]  ;;  %v1386_v60 = vstv %s2865_s17  ;;  %s1434_s24 = sadd.s32 26, %s2440_s29  ;;  %v1352_v0 = vmul.f32 %v1351_v56, %v1350_v54 }
 0x3d9   : > { %s2896_s19 = sld [smem:[#allocation10 + %s1379_s14]]  ;;  %v1419_v61 = vstv %s2870_s25  ;;  %s1468_s20 = sadd.s32 28, %s2427_s26  ;;  %v1387_v2 = vadd.f32 %v1386_v60, %v1385_v57  ;;  %v1404_v3 = vadd.f32 %v1403_v59, %v1401_v58 }
 0x3da   : > { %s2903_s27 = sld [smem:[#allocation10 + %s1415_s13]]  ;;  %v1421_v62 = vstv %s2875_s5  ;;  %s1470_s17 = sadd.s32 28, %s2430_s15  ;;  %v1420_v4 = vmul.f32 %v1419_v61, %v2446_v44  ;;  %v1353_v10 = vadd.f32 %v1352_v0, %v1334_v63 }
 0x3db   : > { %s2909_s4 = sld [smem:[#allocation10 + %s1449_s0]]  ;;  %v1422_v5 = vmul.f32 %v1421_v62, %v2448_v45  ;;  %v1370_v6 = vstv %s2878_s22  ;;  %s1417_s5 = sadd.s32 25, %s2463_s1  ;;  %v1388_v12 = vmax.f32 %v1387_v2, 0.0 }
 0x3dc   : > { %s2911_s6 = sld [smem:[#allocation10 + %s1451_s16]]  ;;  %v1405_v7 = vstv %s2886_s2  ;;  %s1453_s13 = sadd.s32 27, %s2440_s29  ;;  %v1371_v11 = vmul.f32 %v1370_v6, %v1369_v1 }
 0x3dd   : > { %s2914_s18 = sld [smem:[#allocation10 + %s1398_s30]]  ;;  %v1438_v8 = vstv %s2891_s28  ;;  %s1487_s16 = sadd.s32 29, %s2427_s26  ;;  %v1406_v13 = vadd.f32 %v1405_v7, %v1404_v3  ;;  %v1423_v14 = vadd.f32 %v1422_v5, %v1420_v4 }
 0x3de   : > { %s2919_s25 = sld [smem:[#allocation10 + %s1434_s24]]  ;;  %v1440_v9 = vstv %s2893_s3  ;;  %s1489_s2 = sadd.s32 29, %s2430_s15  ;;  %v1439_v17 = vmul.f32 %v1438_v8, %v2446_v44  ;;  %v1372_v21 = vadd.f32 %v1371_v11, %v1353_v10 }
 0x3df   : > { %s2924_s14 = sld [smem:[#allocation10 + %s1468_s20]]  ;;  %v1389_v15 = vstv %s2896_s19  ;;  %s1436_s28 = sadd.s32 26, %s2463_s1  ;;  %v1441_v18 = vmul.f32 %v1440_v9, %v2448_v45  ;;  %v1407_v23 = vmax.f32 %v1406_v13, 0.0 }
 0x3e0   : > { %s2929_s0 = sld [smem:[#allocation10 + %s1470_s17]]  ;;  %v1424_v16 = vstv %s2903_s27  ;;  %s1472_s30 = sadd.s32 28, %s2440_s29  ;;  %v1390_v22 = vmul.f32 %v1389_v15, %v1388_v12 }
 0x3e1   : > { %s2932_s22 = sld [smem:[#allocation10 + %s1417_s5]]  ;;  %v1457_v19 = vstv %s2909_s4  ;;  %s1506_s19 = sadd.s32 30, %s2427_s26  ;;  %v1425_v24 = vadd.f32 %v1424_v16, %v1423_v14  ;;  %v1442_v26 = vadd.f32 %v1441_v18, %v1439_v17 }
 0x3e2   : > { %s2940_s3 = sld [smem:[#allocation10 + %s1453_s13]]  ;;  %v1459_v20 = vstv %s2911_s6  ;;  %s1508_s17 = sadd.s32 30, %s2430_s15  ;;  %v1458_v27 = vmul.f32 %v1457_v19, %v2446_v44  ;;  %v1391_v32 = vadd.f32 %v1390_v22, %v1372_v21 }
 0x3e3   : > { %s2945_s24 = sld [smem:[#allocation10 + %s1487_s16]]  ;;  %v1408_v25 = vstv %s2914_s18  ;;  %s1455_s4 = sadd.s32 27, %s2463_s1  ;;  %v1460_v28 = vmul.f32 %v1459_v20, %v2448_v45  ;;  %v1426_v34 = vmax.f32 %v1425_v24, 0.0 }
 0x3e4   : > { %s2947_s20 = sld [smem:[#allocation10 + %s1489_s2]]  ;;  %v1443_v29 = vstv %s2919_s25  ;;  %s1491_s5 = sadd.s32 29, %s2440_s29  ;;  %v1409_v33 = vmul.f32 %v1408_v25, %v1407_v23 }
 0x3e5   : > { %s2950_s27 = sld [smem:[#allocation10 + %s1436_s28]]  ;;  %v1476_v30 = vstv %s2924_s14  ;;  %s1525_s18 = sadd.s32 31, %s2427_s26  ;;  %v1444_v35 = vadd.f32 %v1443_v29, %v1442_v26  ;;  %v1461_v36 = vadd.f32 %v1460_v28, %v1458_v27 }
 0x3e6   : > { %s2957_s6 = sld [smem:[#allocation10 + %s1472_s30]]  ;;  %v1478_v31 = vstv %s2929_s0  ;;  %s1527_s25 = sadd.s32 31, %s2430_s15  ;;  %v1477_v37 = vmul.f32 %v1476_v30, %v2446_v44  ;;  %v1410_v43 = vadd.f32 %v1409_v33, %v1391_v32 }
 0x3e7   : > { %s2963_s13 = sld [smem:[#allocation10 + %s1506_s19]]  ;;  %v1479_v38 = vmul.f32 %v1478_v31, %v2448_v45  ;;  %v1427_v39 = vstv %s2932_s22  ;;  %s1474_s0 = sadd.s32 28, %s2463_s1  ;;  %v1445_v47 = vmax.f32 %v1444_v35, 0.0 }
 0x3e8   : > { %s2965_s16 = sld [smem:[#allocation10 + %s1508_s17]]  ;;  %v1462_v40 = vstv %s2940_s3  ;;  %s1510_s28 = sadd.s32 30, %s2440_s29  ;;  %v1428_v46 = vmul.f32 %v1427_v39, %v1426_v34 }
 0x3e9   : > { %s2968_s2 = sld [smem:[#allocation10 + %s1455_s4]]  ;;  %v1495_v41 = vstv %s2945_s24  ;;  %v1463_v49 = vadd.f32 %v1462_v40, %v1461_v36  ;;  %v1480_v50 = vadd.f32 %v1479_v38, %v1477_v37  ;;  %s1493_s3 = sadd.s32 29, %s2463_s1  ;;  %v737_v36 = vld [vmem:[#allocation2] sm:$0xff]  ;;  %v2170_v38 = vld [vmem:[#allocation3] sm:$0xff] }
 0x3ea   : > { %s2973_s14 = sld [smem:[#allocation10 + %s1491_s5]]  ;;  %v1497_v42 = vstv %s2947_s20  ;;  %v1496_v53 = vmul.f32 %v1495_v41, %v2446_v44  ;;  %s1529_s24 = sadd.s32 31, %s2440_s29  ;;  %v1429_v57 = vadd.f32 %v1428_v46, %v1410_v43 }
 0x3eb   : > { %s2977_s26 = sld [smem:[#allocation10 + %s1525_s18]]  ;;  %v1446_v51 = vstv %s2950_s27  ;;  %v1498_v54 = vmul.f32 %v1497_v42, %v2448_v45  ;;  %v1464_v59 = vmax.f32 %v1463_v49, 0.0  ;;  %s1512_s29 = sadd.s32 30, %s2463_s1  ;;  %v1633_v49 = vld [vmem:[%s3090_s7] sm:$0x3] (%p1628_p4) }
 0x3ec   : > { %s2982_s15 = sld [smem:[#allocation10 + %s1527_s25]]  ;;  %v1481_v52 = vstv %s2957_s6  ;;  %v1447_v58 = vmul.f32 %v1446_v51, %v1445_v47  ;;  %s1531_s17 = sadd.s32 31, %s2463_s1  ;;  %v2253_v51 = vmov (%p1628_p4), 0.0  }
 0x3ed   : > { %s2986_s22 = sld [smem:[#allocation10 + %s1474_s0]]  ;;  %v1514_v55 = vstv %s2963_s13  ;;  %v1482_v60 = vadd.f32 %v1481_v52, %v1480_v50  ;;  %v1499_v62 = vadd.f32 %v1498_v54, %v1496_v53  ;;  %v1711_v50 = vld [vmem:[%s3091_s8 + $0x18] sm:$0xff] (%p1628_p4)  ;;  %2082 = vmatprep.subr.mxu0 (%p1628_p4), %v2253_v51  ;;  %2087 = vmatprep.subr.mxu1 (%p1628_p4), %v2253_v51  ;;  %v1710_v52 = vld [vmem:[%s3091_s8 + $0x10] sm:$0xff] (%p1628_p4)  ;;  %v1709_v53 = vld [vmem:[%s3091_s8 + $0x8] sm:$0xff] (%p1628_p4) }
 0x3ee   : > { %s2992_s30 = sld [smem:[#allocation10 + %s1510_s28]]  ;;  %v1516_v56 = vstv %s2965_s16  ;;  %v1515_v63 = vmul.f32 %v1514_v55, %v2446_v44  ;;  %v1448_v4 = vadd.f32 %v1447_v58, %v1429_v57  ;;  %v1708_v54 = vld [vmem:[%s3091_s8] sm:$0xff] (%p1628_p4)  ;;  %v1796_v55 = vld [vmem:[%s3093_s10 + $0x18] sm:$0xff] (%p1628_p4)  ;;  %v1795_v58 = vld [vmem:[%s3093_s10 + $0x10] sm:$0xff] (%p1628_p4) }
 0x3ef   : > { %v1465_v61 = vstv %s2968_s2  ;;  %s2998_s20 = sld [smem:[#allocation10 + %s1493_s3]]  ;;  %v1517_v0 = vmul.f32 %v1516_v56, %v2448_v45  ;;  %v1483_v6 = vmax.f32 %v1482_v60, 0.0  ;;  %v1793_v60 = vld [vmem:[%s3093_s10] sm:$0xff] (%p1628_p4) }
 0x3f0   : > { %v1500_v1 = vstv %s2973_s14  ;;  %s1530_s19 = sld [smem:[#allocation10 + %s1529_s24]]  ;;  %v1466_v5 = vmul.f32 %v1465_v61, %v1464_v59  ;;  %v1794_v59 = vld [vmem:[%s3093_s10 + $0x8] sm:$0xff] (%p1628_p4)  ;;  %v1994_v61 = vld [vmem:[%s3092_s9] ss:$0 sm:$0xff] (%p1628_p4) }
 0x3f1   : > { %v1533_v2 = vstv %s2977_s26  ;;  %v1501_v7 = vadd.f32 %v1500_v1, %v1499_v62  ;;  %v1518_v8 = vadd.f32 %v1517_v0, %v1515_v63  ;;  %s1513_s27 = sld [smem:[#allocation10 + %s1512_s29]] }
 0x3f2   : > { %v1535_v3 = vstv %s2982_s15  ;;  %v1534_v9 = vmul.f32 %v1533_v2, %v2446_v44  ;;  %v1467_v13 = vadd.f32 %v1466_v5, %v1448_v4  ;;  %s1532_s4 = sld [smem:[#allocation10 + %s1531_s17]]  ;;  %v1996_v2 = vld [vmem:[%s3094_s11] ss:$0 sm:$0xff] (%p1628_p4) }
 0x3f3   : > { %v1536_v10 = vmul.f32 %v1535_v3, %v2448_v45  ;;  %v1484_v11 = vstv %s2986_s22  ;;  %v1502_v15 = vmax.f32 %v1501_v7, 0.0 }
 0x3f4   : > { %v1519_v12 = vstv %s2992_s30  ;;  %v1485_v14 = vmul.f32 %v1484_v11, %v1483_v6 }
 0x3f5   : > { %v1520_v16 = vadd.f32 %v1519_v12, %v1518_v8  ;;  %v1537_v17 = vadd.f32 %v1536_v10, %v1534_v9  ;;  %v1503_v19 = vstv %s2998_s20 }
 0x3f6   : > { %v1538_v20 = vstv %s1530_s19  ;;  %v1486_v21 = vadd.f32 %v1485_v14, %v1467_v13  ;;  %v1504_v22 = vmul.f32 %v1503_v19, %v1502_v15 }
 0x3f7   : > { %v1521_v23 = vmax.f32 %v1520_v16, 0.0  ;;  %v1539_v44 = vadd.f32 %v1538_v20, %v1537_v17  ;;  %v1522_v45 = vstv %s1513_s27 }
 0x3f8   : > { %v1505_v24 = vadd.f32 %v1504_v22, %v1486_v21  ;;  %v1541_v27 = vstv %s1532_s4 }
 0x3f9   : > { %v1523_v25 = vmul.f32 %v1522_v45, %v1521_v23  ;;  %v1540_v26 = vmax.f32 %v1539_v44, 0.0 }
 0x3fb   : > { %v1524_v28 = vadd.f32 %v1523_v25, %v1505_v24  ;;  %v1542_v29 = vmul.f32 %v1541_v27, %v1540_v26 }
 0x3fd   : > { %v1543_v32 = vadd.f32 %v1542_v29, %v1524_v28 }
 0x434   : > { %v829_v18 = vpop.xlane.xlu1 %828 }
 0x435   : > { %2168 = vrcp.f32 %v829_v18 }
 0x442   : > { %v2169_v30 = vpop.eup %2168 }
 0x443   : > { %v831_v31 = vmul.f32 %v2169_v30, %v2460_v48 }
 0x445   : > { %2075 = vmatmul.mubr.msk.f32.vlgmr.msra.gmra.mxu0 %vm820_vm11, %v831_v31  ;;  %v1544_v33 = vmul.f32 %v1543_v32, %v831_v31 }
 0x446   : > { %2084 = vmatprep.mubr.msk.f32.mxu0 (%p1628_p4), %vm2254_vm12, %v2253_v51 }
 0x447   : > { %2080 = vmatmul.mubr.msk.f32.vlgmr.msra.gmra.mxu1 %vm820_vm11, %v1544_v33  ;;  %v1545_v34 = vsel %vm820_vm11, %v1544_v33, 0.0 }
 0x448   : > { %1546 = vadd.xlane.f32.xlu1 %v1545_v34  ;;  %2088 = vmatpush3.msra.mxu1 (%p1628_p4), %v1711_v50 }
 0x449   : > { %2089 = vmatprep.subr.mxu1 (%p1628_p4), %v2253_v51  ;;  %2095 = vmatprep.mubr.msk.f32.mxu1 (%p1628_p4), %vm2254_vm12, %v2253_v51 }
 0x44a   : > { %2090 = vmatpush3.msra.mxu1 (%p1628_p4), %v1710_v52 }
 0x44b   : > { %2091 = vmatprep.subr.mxu1 (%p1628_p4), %v2253_v51 }
 0x44c   : > { %2092 = vmatpush3.msra.mxu1 (%p1628_p4), %v1709_v53 }
 0x44d   : > { %2093 = vmatprep.subr.mxu1 (%p1628_p4), %v2253_v51 }
 0x44e   : > { %2094 = vmatpush3.msra.mxu1 (%p1628_p4), %v1708_v54 }
 0x4d1   : > { %v1547_v35 = vpop.xlane.xlu1 %1546 }
 0x4d2   : > { %v1621_v39 = vmul.f32 %v2170_v38, %v1547_v35 }
 0x505   : > { %v901_v37 = vpop.f32.mrf.mxu0 }
 0x506   : > { %v905_v40 = vadd.f32 %v901_v37, %v737_v36 }
 0x507   : > { %v2076_v41 = vpop.f32.mrf.mxu0  ;;  %v1617_v42 = vpop.f32.mrf.mxu1 }
 0x508   : > { %1624 = vst.msk [vmem:[#allocation2] sm:$0xff] %vm562_vm7, %v905_v40  ;;  %v1622_v48 = vsub.f32 %v1621_v39, %v1617_v42  ;;  %1632 = sbr.rel (!%p1628_p4) target bundleno = 1883 (0x75b), region = 88 }
 0x509   : > { %v2081_v43 = vpop.f32.mrf.mxu1 }
 0x50a   : > { %v1623_v46 = vadd.f32 %v2170_v38, %v1622_v48 }
 0x50c   : > { %1627 = vst.msk [vmem:[#allocation4] sm:$0xff] %vm654_vm8, %v1623_v46 }
 0x50f   : > { %v1634_v47 = vld [vmem:[#allocation2] sm:$0xff] }
 0x510   : > { %2083 = vmatpush3.msra.mxu0 %v1634_v47 }
 0x511   : > { %2085 = vmatmul.mubr.msk.f32.vlgmr.msra.gmra.mxu0 %vm820_vm11, %v1633_v49  ;;  %2098 = vmatprep.subr.mxu0 %v2253_v51 }
 0x512   : > { %2106 = vmatprep.mubr.msk.f32.mxu0 %vm2254_vm12, %v2253_v51  ;;  %2099 = vmatpush3.msra.mxu0 %v1796_v55 }
 0x513   : > { %2100 = vmatprep.subr.mxu0 %v2253_v51 }
 0x514   : > { %2101 = vmatpush3.msra.mxu0 %v1795_v58 }
 0x515   : > { %2102 = vmatprep.subr.mxu0 %v2253_v51 }
 0x516   : > { %2103 = vmatpush3.msra.mxu0 %v1794_v59 }
 0x517   : > { %2104 = vmatprep.subr.mxu0 %v2253_v51 }
 0x518   : > { %2105 = vmatpush3.msra.mxu0 %v1793_v60 }
 0x5d1   : > { %v1704_v56 = vpop.f32.mrf.mxu0 }
 0x5d2   : > { %2096 = vmatmul.mubr.msk.f32.vlgmr.msra.gmra.mxu1 %vm562_vm7, %v1704_v56 }
 0x5d3   : > { %v2086_v57 = vpop.f32.mrf.mxu0 }
 0x692   : > { %v1788_v62 = vpop.f32.mrf.mxu1 }
 0x693   : > { %v1789_v63 = vadd.f32 %v1994_v61, %v1788_v62 }
 0x694   : > { %v2097_v0 = vpop.f32.mrf.mxu1 }
 0x695   : > { %v1792_v1 = vmax.f32 %v1789_v63, 0.0 }
 0x697   : > { %2107 = vmatmul.mubr.msk.f32.vlgmr.msra.gmra.mxu0 %vm562_vm7, %v1792_v1 }
 0x757   : > { %v1873_v3 = vpop.f32.mrf.mxu0 }
 0x758   : > { %v1874_v4 = vadd.f32 %v1996_v2, %v1873_v3 }
 0x759   : > { %v2108_v5 = vpop.f32.mrf.mxu0 }
 0x75a   : > { %1878 = vst.msk [vmem:[#allocation13] sm:$0x3] %vm1877_vm13, %v1874_v4 }
 0x75b PF: > { %s3118_s17 = sadd.s32 4294967295, %s2240_s23   ;;  %s2255_s1 = smov [#allocation13]  }
 0x75c   : > { %p3059_p5 = scmp.eq.s32.totalorder %s3118_s17, 2  ;;  %s1886_s6 = sshll.u32 %s2255_s1, 4  ;;  %s1887_s6 = int_to_ptr.vmem [resolvable:$true] %s1886_s6 }
 0x75d   : > { %s2186_s5 = scalar_lea.vmem %s1887_s6, 32  ;;  %p2193_p9 = scmp.lt.s32.totalorder %s1887_s6, %s1887_s6 }
 0x75e   : > { %p2187_p6 = scmp.ne.s32.totalorder %s1887_s6, %s2186_s5  ;;  %p2194_p10 = scmp.lt.s32.totalorder %s2186_s5, %s2186_s5 }
 0x760   : > { %p2188_p7 = pnand %p2187_p6, %p3059_p5  ;;  %p2195_p11 = por %p2194_p10, %p2193_p9 }
 0x762   : > { %p2189_p8 = pneg %p2188_p7 }
 0x764   : > { %p2196_p12 = pnand %p2195_p11, %p2189_p8 }
 0x766   : > { %2199 = shalt.err (!%p2196_p12)
}
 0x767   : > { %2114 = dma.vmem_to_hbm [thread:$0]  (%p3059_p5), %s1887_s6, 32, %s3095_s12, [#allocation11]  }
 0x768   : > { %2227 = dma.done.wait (%p3059_p5), [#allocation11], 32  }
 0x769   : > { %2229 = vsyncadd (%p3059_p5), [#allocation11], 4294967264 }
 0x76a PF: > { %s24_s23 = sadd.s32 1, %s2240_s23   ;;  %s3120_s21 = sld [smem:[#allocation16_spill]] }
 0x76b   : > { %p21_p13 = scmp.ge.s32.totalorder %s24_s23, 5   ;;  %s3121_s22 = sld [smem:[#allocation17_spill]] }
 0x76d   :  { %23 = sbr.rel (!%p21_p13) target bundleno = 11 (0xb), region = 123 }
 0x772   :  { %1899 = vsyncpa [#allocation11], 1 }
 0x773   :  { %1901 = vsyncpa [#allocation11 + $0x1], 1 }
 0x774   :  { %1902 = vsyncpa [#allocation12], 1 }
 0x775   :  { %1904 = vsyncpa [#allocation12 + $0x1], 1 }

</bundles_post_ra>
